<compile_context>
chip_gen: v7x
topology: tpu7x:2x2x1
jax: 0.10.0
libtpu: 0.0.40
codegen_flags: <defaults>
</compile_context>

<pallas_src>
import jax
import jax.numpy as jnp
from jax.experimental import pallas as pl
from jax.experimental.pallas import tpu as pltpu


def _rnnlm_kernel(
    # inputs
    embed_ref,     # (T, B_pad, E)       embedded tokens, time-major, batch-padded
    h0_ref,        # (B_pad, GP)         initial hidden state (H padded to GP=128)
    w_i_ref,       # (E, 3*GP)           fused input->gate weights  [r | z | n], pre-transposed
    w_h_ref,       # (GP, 3*GP)          fused hidden->gate weights [r | z | n], pre-transposed
    b_i_ref,       # (1, 3*GP)           fused input biases
    b_h_ref,       # (1, 3*GP)           fused hidden biases
    w_out_ref,     # (GP, V_pad)         output projection, pre-transposed, zero-padded
    b_out_ref,     # (1, V_pad)
    # outputs
    out_ref,       # (T, B_pad, V_pad)   logits
    hN_ref,        # (B_pad, GP)         final hidden state
    # scratch
    hs_scratch,    # (T, B_pad, GP) f32  all hidden states (feeds the batched projection)
):
    T, B_pad, _ = embed_ref.shape
    GP = hs_scratch.shape[-1]          # padded per-gate / hidden width (128)
    V_pad = out_ref.shape[-1]

    # Weights / biases stay resident in vregs/VMEM for the whole recurrence.
    w_i = w_i_ref[...]
    w_h = w_h_ref[...]
    b_i = b_i_ref[...]
    b_h = b_h_ref[...]

    h = h0_ref[...].astype(jnp.float32)          # (B_pad, GP)

    # PyTorch GRU gate equations (gate order r, z, n):
    #   r = sigmoid(x W_ir^T + b_ir + h W_hr^T + b_hr)
    #   z = sigmoid(x W_iz^T + b_iz + h W_hz^T + b_hz)
    #   n = tanh   (x W_in^T + b_in + r * (h W_hn^T + b_hn))
    #   h = (1 - z) * n + z * h_prev
    # T is a small static constant -> fully unrolled straight-line recurrence.
    for t in range(T):
        x = embed_ref[t]                                                    # (B_pad, E)
        gx = jnp.dot(x, w_i, preferred_element_type=jnp.float32) + b_i      # (B_pad, 3*GP)
        gh = jnp.dot(h, w_h, preferred_element_type=jnp.float32) + b_h      # (B_pad, 3*GP)

        xr, xz, xn = gx[:, 0:GP], gx[:, GP:2 * GP], gx[:, 2 * GP:3 * GP]
        hr, hz, hn = gh[:, 0:GP], gh[:, GP:2 * GP], gh[:, 2 * GP:3 * GP]

        r = jax.nn.sigmoid(xr + hr)
        z = jax.nn.sigmoid(xz + hz)
        n = jnp.tanh(xn + r * hn)
        h = (1.0 - z) * n + z * h                                           # (B_pad, GP)

        hs_scratch[t] = h

    hN_ref[...] = h.astype(hN_ref.dtype)

    # Batched output projection (nn.Linear): one (T*B_pad, GP) @ (GP, V_pad) matmul,
    # one lane-dense store of the full logits block.
    hs = hs_scratch[...].reshape(T * B_pad, GP)
    logits = jnp.dot(hs, w_out_ref[...], preferred_element_type=jnp.float32) + b_out_ref[...]
    out_ref[...] = logits.reshape(T, B_pad, V_pad).astype(out_ref.dtype)


def rnnlm_forward_pallas(indices, params, h0):
    """indices: (B, T) int32.  Returns (logits (B, T, V), h_N (1, B, H))."""
    B, T = indices.shape
    emb_table = params["embedding"]          # (V, E)
    V, E = emb_table.shape
    H = params["w_hr"].shape[0]

    GP = 128                                 # padded hidden / per-gate lane group
    B_pad = max(8, ((B + 7) // 8) * 8)       # sublane granule
    V_pad = ((V + 127) // 128) * 128         # lane granule (lane-dense output store)

    # Glue: embedding gather + dropout (eval mode == identity), time-major, batch-padded.
    # TODO(synk): nn.Dropout in training mode (p=0.5 random masking) not implemented;
    # this matches model.eval() semantics.
    embed = emb_table[indices]                           # (B, T, E)
    embed_tm = jnp.transpose(embed, (1, 0, 2))           # (T, B, E)
    embed_tm = jnp.pad(embed_tm, ((0, 0), (0, B_pad - B), (0, 0)))

    h0_pad = jnp.zeros((B_pad, GP), jnp.float32).at[:B, :H].set(h0)

    # Fused, padded gate weights: each gate in its own 128-lane group; padded
    # rows/lanes are zero so padded hidden lanes stay exactly zero.
    def fuse_gate_w(wr, wz, wn, rows_pad, rows):
        w = jnp.zeros((rows_pad, 3 * GP), jnp.float32)
        w = w.at[:rows, 0 * GP:0 * GP + H].set(wr.T)
        w = w.at[:rows, 1 * GP:1 * GP + H].set(wz.T)
        w = w.at[:rows, 2 * GP:2 * GP + H].set(wn.T)
        return w

    def fuse_gate_b(br, bz, bn):
        b = jnp.zeros((1, 3 * GP), jnp.float32)
        b = b.at[0, 0 * GP:0 * GP + H].set(br)
        b = b.at[0, 1 * GP:1 * GP + H].set(bz)
        b = b.at[0, 2 * GP:2 * GP + H].set(bn)
        return b

    w_i_fused = fuse_gate_w(params["w_ir"], params["w_iz"], params["w_in"], E, E)
    w_h_fused = fuse_gate_w(params["w_hr"], params["w_hz"], params["w_hn"], GP, H)
    b_i_fused = fuse_gate_b(params["b_ir"], params["b_iz"], params["b_in"])
    b_h_fused = fuse_gate_b(params["b_hr"], params["b_hz"], params["b_hn"])

    w_out_pad = jnp.zeros((GP, V_pad), jnp.float32).at[:H, :V].set(params["w_out"].T)
    b_out_pad = jnp.zeros((1, V_pad), jnp.float32).at[0, :V].set(params["b_out"])

    full2 = lambda shape: pl.BlockSpec(shape, lambda i: (0, 0))
    full3 = lambda shape: pl.BlockSpec(shape, lambda i: (0, 0, 0))

    out_pad, hN_pad = pl.pallas_call(
        _rnnlm_kernel,
        out_shape=(
            jax.ShapeDtypeStruct((T, B_pad, V_pad), jnp.float32),
            jax.ShapeDtypeStruct((B_pad, GP), jnp.float32),
        ),
        grid_spec=pltpu.PrefetchScalarGridSpec(
            num_scalar_prefetch=0,
            grid=(1,),                        # single invocation; recurrence unrolled in-kernel
            in_specs=[
                full3((T, B_pad, E)),         # embed
                full2((B_pad, GP)),           # h0
                full2((E, 3 * GP)),           # fused input->gate weights
                full2((GP, 3 * GP)),          # fused hidden->gate weights
                full2((1, 3 * GP)),           # fused input biases
                full2((1, 3 * GP)),           # fused hidden biases
                full2((GP, V_pad)),           # output projection
                full2((1, V_pad)),            # output bias
            ],
            out_specs=[
                full3((T, B_pad, V_pad)),     # logits
                full2((B_pad, GP)),           # final hidden
            ],
            scratch_shapes=[pltpu.VMEM((T, B_pad, GP), jnp.float32)],
        ),
        compiler_params=pltpu.CompilerParams(
            dimension_semantics=("arbitrary",),
        ),
    )(
        embed_tm, h0_pad,
        w_i_fused, w_h_fused, b_i_fused, b_h_fused,
        w_out_pad, b_out_pad,
    )

    # Strip padding, restore batch_first (B, T, V) and (num_layers=1, B, H).
    logits = jnp.transpose(out_pad[:, :B, :V], (1, 0, 2))
    h_last = hN_pad[:B, :H]
    return logits, h_last[None]


def rnnlm_forward_ref(indices, params, h0):
    """Pure-JAX reference (lax.scan) for correctness checking."""
    emb_table = params["embedding"]
    embed = emb_table[indices]                   # (B, T, E)

    def step(h, x_t):
        xr = x_t @ params["w_ir"].T + params["b_ir"]
        xz = x_t @ params["w_iz"].T + params["b_iz"]
        xn = x_t @ params["w_in"].T + params["b_in"]
        hr = h @ params["w_hr"].T + params["b_hr"]
        hz = h @ params["w_hz"].T + params["b_hz"]
        hn = h @ params["w_hn"].T + params["b_hn"]
        r = jax.nn.sigmoid(xr + hr)
        z = jax.nn.sigmoid(xz + hz)
        n = jnp.tanh(xn + r * hn)
        h_new = (1.0 - z) * n + z * h
        return h_new, h_new

    h_last, hs = jax.lax.scan(step, h0, jnp.transpose(embed, (1, 0, 2)))
    gru_out = jnp.transpose(hs, (1, 0, 2))       # (B, T, H)
    logits = gru_out @ params["w_out"].T + params["b_out"]
    return logits, h_last[None]


def init_params(key, vocab_size, embedding_dim, hidden_dim):
    ks = jax.random.split(key, 16)
    u = lambda k, shape, s: jax.random.uniform(k, shape, jnp.float32, -s, s)
    sh = 1.0 / (hidden_dim ** 0.5)
    return {
        "embedding": jax.random.normal(ks[0], (vocab_size, embedding_dim), jnp.float32),
        # GRU layer 0 weights (PyTorch gate order r, z, n)
        "w_ir": u(ks[1], (hidden_dim, embedding_dim), sh),
        "w_iz": u(ks[2], (hidden_dim, embedding_dim), sh),
        "w_in": u(ks[3], (hidden_dim, embedding_dim), sh),
        "w_hr": u(ks[4], (hidden_dim, hidden_dim), sh),
        "w_hz": u(ks[5], (hidden_dim, hidden_dim), sh),
        "w_hn": u(ks[6], (hidden_dim, hidden_dim), sh),
        "b_ir": u(ks[7], (hidden_dim,), sh),
        "b_iz": u(ks[8], (hidden_dim,), sh),
        "b_in": u(ks[9], (hidden_dim,), sh),
        "b_hr": u(ks[10], (hidden_dim,), sh),
        "b_hz": u(ks[11], (hidden_dim,), sh),
        "b_hn": u(ks[12], (hidden_dim,), sh),
        # Output Linear
        "w_out": u(ks[13], (vocab_size, hidden_dim), sh),
        "b_out": u(ks[14], (vocab_size,), sh),
    }


if __name__ == "__main__":
    # Small, deterministic shapes consistent with the module:
    # vocab_size=64, embedding_dim=16, hidden_dim=32, batch=4, seq=8, num_layers=1
    VOCAB, EMB, HID = 64, 16, 32
    B, T = 4, 8

    key = jax.random.PRNGKey(0)
    k_param, k_idx = jax.random.split(key)
    params = init_params(k_param, VOCAB, EMB, HID)
    indices = jax.random.randint(k_idx, (B, T), 0, VOCAB, dtype=jnp.int32)
    h0 = jnp.zeros((B, HID), jnp.float32)   # init_hidden(): zeros

    logits, h_last = rnnlm_forward_pallas(indices, params, h0)
    logits = jax.block_until_ready(logits)
    h_last = jax.block_until_ready(h_last)

    # Correctness check against a pure-JAX reference.
    ref_logits, ref_h = rnnlm_forward_ref(indices, params, h0)
    assert logits.shape == (B, T, VOCAB)
    assert h_last.shape == (1, B, HID)
    assert jnp.allclose(logits, ref_logits, atol=1e-5, rtol=1e-5)
    assert jnp.allclose(h_last, ref_h, atol=1e-5, rtol=1e-5)

    print("KERNEL_OK")
</pallas_src>

<mosaic_0001>
module attributes {stable_mosaic.version = 11 : i64} {
  func.func @_rnnlm_kernel(%arg0: i32, %arg1: memref<8x8x16xf32, #tpu.memory_space<vmem>>, %arg2: memref<8x128xf32, #tpu.memory_space<vmem>>, %arg3: memref<16x384xf32, #tpu.memory_space<vmem>>, %arg4: memref<128x384xf32, #tpu.memory_space<vmem>>, %arg5: memref<1x384xf32, #tpu.memory_space<vmem>>, %arg6: memref<1x384xf32, #tpu.memory_space<vmem>>, %arg7: memref<128x128xf32, #tpu.memory_space<vmem>>, %arg8: memref<1x128xf32, #tpu.memory_space<vmem>>, %arg9: memref<8x8x128xf32, #tpu.memory_space<vmem>>, %arg10: memref<8x128xf32, #tpu.memory_space<vmem>>, %arg11: memref<8x8x128xf32, #tpu.memory_space<vmem>>) attributes {dimension_semantics = [#tpu.dimension_semantics<arbitrary>], iteration_bounds = array<i64: 1>, scalar_prefetch = 0 : i64, scratch_operands = 1 : i64, tpu.core_type = #tpu.core_type<tc>, window_params = [{pipeline_mode = #tpu.pipeline_mode<synchronous>, transform_indices = @transform_0, window_bounds = array<i64: 8, 8, 16>}, {pipeline_mode = #tpu.pipeline_mode<synchronous>, transform_indices = @transform_1, window_bounds = array<i64: 8, 128>}, {pipeline_mode = #tpu.pipeline_mode<synchronous>, transform_indices = @transform_2, window_bounds = array<i64: 16, 384>}, {pipeline_mode = #tpu.pipeline_mode<synchronous>, transform_indices = @transform_3, window_bounds = array<i64: 128, 384>}, {pipeline_mode = #tpu.pipeline_mode<synchronous>, transform_indices = @transform_4, window_bounds = array<i64: 1, 384>}, {pipeline_mode = #tpu.pipeline_mode<synchronous>, transform_indices = @transform_5, window_bounds = array<i64: 1, 384>}, {pipeline_mode = #tpu.pipeline_mode<synchronous>, transform_indices = @transform_6, window_bounds = array<i64: 128, 128>}, {pipeline_mode = #tpu.pipeline_mode<synchronous>, transform_indices = @transform_7, window_bounds = array<i64: 1, 128>}, {pipeline_mode = #tpu.pipeline_mode<synchronous>, transform_indices = @transform_8, window_bounds = array<i64: 8, 8, 128>}, {pipeline_mode = #tpu.pipeline_mode<synchronous>, transform_indices = @transform_9, window_bounds = array<i64: 8, 128>}]} {
    %c0 = arith.constant 0 : index
    %c0_0 = arith.constant 0 : index
    %0 = vector.load %arg3[%c0, %c0_0] : memref<16x384xf32, #tpu.memory_space<vmem>>, vector<16x384xf32>
    %c0_1 = arith.constant 0 : index
    %c0_2 = arith.constant 0 : index
    %1 = vector.load %arg4[%c0_1, %c0_2] : memref<128x384xf32, #tpu.memory_space<vmem>>, vector<128x384xf32>
    %c0_3 = arith.constant 0 : index
    %c0_4 = arith.constant 0 : index
    %2 = vector.load %arg5[%c0_3, %c0_4] : memref<1x384xf32, #tpu.memory_space<vmem>>, vector<1x384xf32>
    %c0_5 = arith.constant 0 : index
    %c0_6 = arith.constant 0 : index
    %3 = vector.load %arg6[%c0_5, %c0_6] : memref<1x384xf32, #tpu.memory_space<vmem>>, vector<1x384xf32>
    %c0_7 = arith.constant 0 : index
    %c0_8 = arith.constant 0 : index
    %4 = vector.load %arg2[%c0_7, %c0_8] : memref<8x128xf32, #tpu.memory_space<vmem>>, vector<8x128xf32>
    %c0_9 = arith.constant 0 : index
    %c0_10 = arith.constant 0 : index
    %c0_11 = arith.constant 0 : index
    %5 = vector.load %arg1[%c0_9, %c0_10, %c0_11] : memref<8x8x16xf32, #tpu.memory_space<vmem>>, vector<1x8x16xf32>
    %6 = vector.shape_cast %5 : vector<1x8x16xf32> to vector<8x16xf32>
    %cst = arith.constant dense<0.000000e+00> : vector<8x384xf32>
    %7 = tpu.matmul %6, %0, %cst {dimension_numbers = #tpu.dot_dimension_numbers<[1], [0], [0], [1], [0, 0, 1, 1], [], []>} : vector<8x16xf32>, vector<16x384xf32>, vector<8x384xf32> -> vector<8x384xf32>
    %8 = vector.broadcast %2 : vector<1x384xf32> to vector<8x384xf32>
    %9 = arith.addf %7, %8 : vector<8x384xf32>
    %cst_12 = arith.constant dense<0.000000e+00> : vector<8x384xf32>
    %10 = tpu.matmul %4, %1, %cst_12 {dimension_numbers = #tpu.dot_dimension_numbers<[1], [0], [0], [1], [0, 0, 1, 1], [], []>} : vector<8x128xf32>, vector<128x384xf32>, vector<8x384xf32> -> vector<8x384xf32>
    %11 = vector.broadcast %3 : vector<1x384xf32> to vector<8x384xf32>
    %12 = arith.addf %10, %11 : vector<8x384xf32>
    %13 = vector.extract_strided_slice %9 {offsets = [0, 0], sizes = [8, 128], strides = [1, 1]} : vector<8x384xf32> to vector<8x128xf32>
    %14 = vector.extract_strided_slice %9 {offsets = [0, 128], sizes = [8, 128], strides = [1, 1]} : vector<8x384xf32> to vector<8x128xf32>
    %15 = vector.extract_strided_slice %9 {offsets = [0, 256], sizes = [8, 128], strides = [1, 1]} : vector<8x384xf32> to vector<8x128xf32>
    %16 = vector.extract_strided_slice %12 {offsets = [0, 0], sizes = [8, 128], strides = [1, 1]} : vector<8x384xf32> to vector<8x128xf32>
    %17 = vector.extract_strided_slice %12 {offsets = [0, 128], sizes = [8, 128], strides = [1, 1]} : vector<8x384xf32> to vector<8x128xf32>
    %18 = vector.extract_strided_slice %12 {offsets = [0, 256], sizes = [8, 128], strides = [1, 1]} : vector<8x384xf32> to vector<8x128xf32>
    %19 = arith.addf %13, %16 : vector<8x128xf32>
    %20 = arith.negf %19 : vector<8x128xf32>
    %21 = math.exp %20 : vector<8x128xf32>
    %cst_13 = arith.constant 1.000000e+00 : f32
    %22 = vector.broadcast %cst_13 : f32 to vector<8x128xf32>
    %23 = arith.addf %22, %21 : vector<8x128xf32>
    %24 = arith.divf %22, %23 : vector<8x128xf32>
    %25 = arith.addf %14, %17 : vector<8x128xf32>
    %26 = arith.negf %25 : vector<8x128xf32>
    %27 = math.exp %26 : vector<8x128xf32>
    %cst_14 = arith.constant 1.000000e+00 : f32
    %28 = vector.broadcast %cst_14 : f32 to vector<8x128xf32>
    %29 = arith.addf %28, %27 : vector<8x128xf32>
    %30 = arith.divf %28, %29 : vector<8x128xf32>
    %31 = arith.mulf %24, %18 : vector<8x128xf32>
    %32 = arith.addf %15, %31 : vector<8x128xf32>
    %33 = math.tanh %32 : vector<8x128xf32>
    %cst_15 = arith.constant 1.000000e+00 : f32
    %34 = vector.broadcast %cst_15 : f32 to vector<8x128xf32>
    %35 = arith.subf %34, %30 : vector<8x128xf32>
    %36 = arith.mulf %35, %33 : vector<8x128xf32>
    %37 = arith.mulf %30, %4 : vector<8x128xf32>
    %38 = arith.addf %36, %37 : vector<8x128xf32>
    %c0_16 = arith.constant 0 : index
    %c0_17 = arith.constant 0 : index
    %c0_18 = arith.constant 0 : index
    %39 = vector.load %arg11[%c0_16, %c0_17, %c0_18] : memref<8x8x128xf32, #tpu.memory_space<vmem>>, vector<1x8x128xf32>
    %40 = vector.shape_cast %39 : vector<1x8x128xf32> to vector<8x128xf32>
    %41 = vector.shape_cast %38 : vector<8x128xf32> to vector<1x8x128xf32>
    tpu.vector_store %arg11[%c0_16, %c0_17, %c0_18], %41 {strides = array<i32>} : memref<8x8x128xf32, #tpu.memory_space<vmem>>, vector<1x8x128xf32>,
    %c1 = arith.constant 1 : index
    %c0_19 = arith.constant 0 : index
    %c0_20 = arith.constant 0 : index
    %42 = vector.load %arg1[%c1, %c0_19, %c0_20] : memref<8x8x16xf32, #tpu.memory_space<vmem>>, vector<1x8x16xf32>
    %43 = vector.shape_cast %42 : vector<1x8x16xf32> to vector<8x16xf32>
    %cst_21 = arith.constant dense<0.000000e+00> : vector<8x384xf32>
    %44 = tpu.matmul %43, %0, %cst_21 {dimension_numbers = #tpu.dot_dimension_numbers<[1], [0], [0], [1], [0, 0, 1, 1], [], []>} : vector<8x16xf32>, vector<16x384xf32>, vector<8x384xf32> -> vector<8x384xf32>
    %45 = vector.broadcast %2 : vector<1x384xf32> to vector<8x384xf32>
    %46 = arith.addf %44, %45 : vector<8x384xf32>
    %cst_22 = arith.constant dense<0.000000e+00> : vector<8x384xf32>
    %47 = tpu.matmul %38, %1, %cst_22 {dimension_numbers = #tpu.dot_dimension_numbers<[1], [0], [0], [1], [0, 0, 1, 1], [], []>} : vector<8x128xf32>, vector<128x384xf32>, vector<8x384xf32> -> vector<8x384xf32>
    %48 = vector.broadcast %3 : vector<1x384xf32> to vector<8x384xf32>
    %49 = arith.addf %47, %48 : vector<8x384xf32>
    %50 = vector.extract_strided_slice %46 {offsets = [0, 0], sizes = [8, 128], strides = [1, 1]} : vector<8x384xf32> to vector<8x128xf32>
    %51 = vector.extract_strided_slice %46 {offsets = [0, 128], sizes = [8, 128], strides = [1, 1]} : vector<8x384xf32> to vector<8x128xf32>
    %52 = vector.extract_strided_slice %46 {offsets = [0, 256], sizes = [8, 128], strides = [1, 1]} : vector<8x384xf32> to vector<8x128xf32>
    %53 = vector.extract_strided_slice %49 {offsets = [0, 0], sizes = [8, 128], strides = [1, 1]} : vector<8x384xf32> to vector<8x128xf32>
    %54 = vector.extract_strided_slice %49 {offsets = [0, 128], sizes = [8, 128], strides = [1, 1]} : vector<8x384xf32> to vector<8x128xf32>
    %55 = vector.extract_strided_slice %49 {offsets = [0, 256], sizes = [8, 128], strides = [1, 1]} : vector<8x384xf32> to vector<8x128xf32>
    %56 = arith.addf %50, %53 : vector<8x128xf32>
    %57 = arith.negf %56 : vector<8x128xf32>
    %58 = math.exp %57 : vector<8x128xf32>
    %cst_23 = arith.constant 1.000000e+00 : f32
    %59 = vector.broadcast %cst_23 : f32 to vector<8x128xf32>
    %60 = arith.addf %59, %58 : vector<8x128xf32>
    %61 = arith.divf %59, %60 : vector<8x128xf32>
    %62 = arith.addf %51, %54 : vector<8x128xf32>
    %63 = arith.negf %62 : vector<8x128xf32>
    %64 = math.exp %63 : vector<8x128xf32>
    %cst_24 = arith.constant 1.000000e+00 : f32
    %65 = vector.broadcast %cst_24 : f32 to vector<8x128xf32>
    %66 = arith.addf %65, %64 : vector<8x128xf32>
    %67 = arith.divf %65, %66 : vector<8x128xf32>
    %68 = arith.mulf %61, %55 : vector<8x128xf32>
    %69 = arith.addf %52, %68 : vector<8x128xf32>
    %70 = math.tanh %69 : vector<8x128xf32>
    %cst_25 = arith.constant 1.000000e+00 : f32
    %71 = vector.broadcast %cst_25 : f32 to vector<8x128xf32>
    %72 = arith.subf %71, %67 : vector<8x128xf32>
    %73 = arith.mulf %72, %70 : vector<8x128xf32>
    %74 = arith.mulf %67, %38 : vector<8x128xf32>
    %75 = arith.addf %73, %74 : vector<8x128xf32>
    %c1_26 = arith.constant 1 : index
    %c0_27 = arith.constant 0 : index
    %c0_28 = arith.constant 0 : index
    %76 = vector.load %arg11[%c1_26, %c0_27, %c0_28] : memref<8x8x128xf32, #tpu.memory_space<vmem>>, vector<1x8x128xf32>
    %77 = vector.shape_cast %76 : vector<1x8x128xf32> to vector<8x128xf32>
    %78 = vector.shape_cast %75 : vector<8x128xf32> to vector<1x8x128xf32>
    tpu.vector_store %arg11[%c1_26, %c0_27, %c0_28], %78 {strides = array<i32>} : memref<8x8x128xf32, #tpu.memory_space<vmem>>, vector<1x8x128xf32>,
    %c2 = arith.constant 2 : index
    %c0_29 = arith.constant 0 : index
    %c0_30 = arith.constant 0 : index
    %79 = vector.load %arg1[%c2, %c0_29, %c0_30] : memref<8x8x16xf32, #tpu.memory_space<vmem>>, vector<1x8x16xf32>
    %80 = vector.shape_cast %79 : vector<1x8x16xf32> to vector<8x16xf32>
    %cst_31 = arith.constant dense<0.000000e+00> : vector<8x384xf32>
    %81 = tpu.matmul %80, %0, %cst_31 {dimension_numbers = #tpu.dot_dimension_numbers<[1], [0], [0], [1], [0, 0, 1, 1], [], []>} : vector<8x16xf32>, vector<16x384xf32>, vector<8x384xf32> -> vector<8x384xf32>
    %82 = vector.broadcast %2 : vector<1x384xf32> to vector<8x384xf32>
    %83 = arith.addf %81, %82 : vector<8x384xf32>
    %cst_32 = arith.constant dense<0.000000e+00> : vector<8x384xf32>
    %84 = tpu.matmul %75, %1, %cst_32 {dimension_numbers = #tpu.dot_dimension_numbers<[1], [0], [0], [1], [0, 0, 1, 1], [], []>} : vector<8x128xf32>, vector<128x384xf32>, vector<8x384xf32> -> vector<8x384xf32>
    %85 = vector.broadcast %3 : vector<1x384xf32> to vector<8x384xf32>
    %86 = arith.addf %84, %85 : vector<8x384xf32>
    %87 = vector.extract_strided_slice %83 {offsets = [0, 0], sizes = [8, 128], strides = [1, 1]} : vector<8x384xf32> to vector<8x128xf32>
    %88 = vector.extract_strided_slice %83 {offsets = [0, 128], sizes = [8, 128], strides = [1, 1]} : vector<8x384xf32> to vector<8x128xf32>
    %89 = vector.extract_strided_slice %83 {offsets = [0, 256], sizes = [8, 128], strides = [1, 1]} : vector<8x384xf32> to vector<8x128xf32>
    %90 = vector.extract_strided_slice %86 {offsets = [0, 0], sizes = [8, 128], strides = [1, 1]} : vector<8x384xf32> to vector<8x128xf32>
    %91 = vector.extract_strided_slice %86 {offsets = [0, 128], sizes = [8, 128], strides = [1, 1]} : vector<8x384xf32> to vector<8x128xf32>
    %92 = vector.extract_strided_slice %86 {offsets = [0, 256], sizes = [8, 128], strides = [1, 1]} : vector<8x384xf32> to vector<8x128xf32>
    %93 = arith.addf %87, %90 : vector<8x128xf32>
    %94 = arith.negf %93 : vector<8x128xf32>
    %95 = math.exp %94 : vector<8x128xf32>
    %cst_33 = arith.constant 1.000000e+00 : f32
    %96 = vector.broadcast %cst_33 : f32 to vector<8x128xf32>
    %97 = arith.addf %96, %95 : vector<8x128xf32>
    %98 = arith.divf %96, %97 : vector<8x128xf32>
    %99 = arith.addf %88, %91 : vector<8x128xf32>
    %100 = arith.negf %99 : vector<8x128xf32>
    %101 = math.exp %100 : vector<8x128xf32>
    %cst_34 = arith.constant 1.000000e+00 : f32
    %102 = vector.broadcast %cst_34 : f32 to vector<8x128xf32>
    %103 = arith.addf %102, %101 : vector<8x128xf32>
    %104 = arith.divf %102, %103 : vector<8x128xf32>
    %105 = arith.mulf %98, %92 : vector<8x128xf32>
    %106 = arith.addf %89, %105 : vector<8x128xf32>
    %107 = math.tanh %106 : vector<8x128xf32>
    %cst_35 = arith.constant 1.000000e+00 : f32
    %108 = vector.broadcast %cst_35 : f32 to vector<8x128xf32>
    %109 = arith.subf %108, %104 : vector<8x128xf32>
    %110 = arith.mulf %109, %107 : vector<8x128xf32>
    %111 = arith.mulf %104, %75 : vector<8x128xf32>
    %112 = arith.addf %110, %111 : vector<8x128xf32>
    %c2_36 = arith.constant 2 : index
    %c0_37 = arith.constant 0 : index
    %c0_38 = arith.constant 0 : index
    %113 = vector.load %arg11[%c2_36, %c0_37, %c0_38] : memref<8x8x128xf32, #tpu.memory_space<vmem>>, vector<1x8x128xf32>
    %114 = vector.shape_cast %113 : vector<1x8x128xf32> to vector<8x128xf32>
    %115 = vector.shape_cast %112 : vector<8x128xf32> to vector<1x8x128xf32>
    tpu.vector_store %arg11[%c2_36, %c0_37, %c0_38], %115 {strides = array<i32>} : memref<8x8x128xf32, #tpu.memory_space<vmem>>, vector<1x8x128xf32>,
    %c3 = arith.constant 3 : index
    %c0_39 = arith.constant 0 : index
    %c0_40 = arith.constant 0 : index
    %116 = vector.load %arg1[%c3, %c0_39, %c0_40] : memref<8x8x16xf32, #tpu.memory_space<vmem>>, vector<1x8x16xf32>
    %117 = vector.shape_cast %116 : vector<1x8x16xf32> to vector<8x16xf32>
    %cst_41 = arith.constant dense<0.000000e+00> : vector<8x384xf32>
    %118 = tpu.matmul %117, %0, %cst_41 {dimension_numbers = #tpu.dot_dimension_numbers<[1], [0], [0], [1], [0, 0, 1, 1], [], []>} : vector<8x16xf32>, vector<16x384xf32>, vector<8x384xf32> -> vector<8x384xf32>
    %119 = vector.broadcast %2 : vector<1x384xf32> to vector<8x384xf32>
    %120 = arith.addf %118, %119 : vector<8x384xf32>
    %cst_42 = arith.constant dense<0.000000e+00> : vector<8x384xf32>
    %121 = tpu.matmul %112, %1, %cst_42 {dimension_numbers = #tpu.dot_dimension_numbers<[1], [0], [0], [1], [0, 0, 1, 1], [], []>} : vector<8x128xf32>, vector<128x384xf32>, vector<8x384xf32> -> vector<8x384xf32>
    %122 = vector.broadcast %3 : vector<1x384xf32> to vector<8x384xf32>
    %123 = arith.addf %121, %122 : vector<8x384xf32>
    %124 = vector.extract_strided_slice %120 {offsets = [0, 0], sizes = [8, 128], strides = [1, 1]} : vector<8x384xf32> to vector<8x128xf32>
    %125 = vector.extract_strided_slice %120 {offsets = [0, 128], sizes = [8, 128], strides = [1, 1]} : vector<8x384xf32> to vector<8x128xf32>
    %126 = vector.extract_strided_slice %120 {offsets = [0, 256], sizes = [8, 128], strides = [1, 1]} : vector<8x384xf32> to vector<8x128xf32>
    %127 = vector.extract_strided_slice %123 {offsets = [0, 0], sizes = [8, 128], strides = [1, 1]} : vector<8x384xf32> to vector<8x128xf32>
    %128 = vector.extract_strided_slice %123 {offsets = [0, 128], sizes = [8, 128], strides = [1, 1]} : vector<8x384xf32> to vector<8x128xf32>
    %129 = vector.extract_strided_slice %123 {offsets = [0, 256], sizes = [8, 128], strides = [1, 1]} : vector<8x384xf32> to vector<8x128xf32>
    %130 = arith.addf %124, %127 : vector<8x128xf32>
    %131 = arith.negf %130 : vector<8x128xf32>
    %132 = math.exp %131 : vector<8x128xf32>
    %cst_43 = arith.constant 1.000000e+00 : f32
    %133 = vector.broadcast %cst_43 : f32 to vector<8x128xf32>
    %134 = arith.addf %133, %132 : vector<8x128xf32>
    %135 = arith.divf %133, %134 : vector<8x128xf32>
    %136 = arith.addf %125, %128 : vector<8x128xf32>
    %137 = arith.negf %136 : vector<8x128xf32>
    %138 = math.exp %137 : vector<8x128xf32>
    %cst_44 = arith.constant 1.000000e+00 : f32
    %139 = vector.broadcast %cst_44 : f32 to vector<8x128xf32>
    %140 = arith.addf %139, %138 : vector<8x128xf32>
    %141 = arith.divf %139, %140 : vector<8x128xf32>
    %142 = arith.mulf %135, %129 : vector<8x128xf32>
    %143 = arith.addf %126, %142 : vector<8x128xf32>
    %144 = math.tanh %143 : vector<8x128xf32>
    %cst_45 = arith.constant 1.000000e+00 : f32
    %145 = vector.broadcast %cst_45 : f32 to vector<8x128xf32>
    %146 = arith.subf %145, %141 : vector<8x128xf32>
    %147 = arith.mulf %146, %144 : vector<8x128xf32>
    %148 = arith.mulf %141, %112 : vector<8x128xf32>
    %149 = arith.addf %147, %148 : vector<8x128xf32>
    %c3_46 = arith.constant 3 : index
    %c0_47 = arith.constant 0 : index
    %c0_48 = arith.constant 0 : index
    %150 = vector.load %arg11[%c3_46, %c0_47, %c0_48] : memref<8x8x128xf32, #tpu.memory_space<vmem>>, vector<1x8x128xf32>
    %151 = vector.shape_cast %150 : vector<1x8x128xf32> to vector<8x128xf32>
    %152 = vector.shape_cast %149 : vector<8x128xf32> to vector<1x8x128xf32>
    tpu.vector_store %arg11[%c3_46, %c0_47, %c0_48], %152 {strides = array<i32>} : memref<8x8x128xf32, #tpu.memory_space<vmem>>, vector<1x8x128xf32>,
    %c4 = arith.constant 4 : index
    %c0_49 = arith.constant 0 : index
    %c0_50 = arith.constant 0 : index
    %153 = vector.load %arg1[%c4, %c0_49, %c0_50] : memref<8x8x16xf32, #tpu.memory_space<vmem>>, vector<1x8x16xf32>
    %154 = vector.shape_cast %153 : vector<1x8x16xf32> to vector<8x16xf32>
    %cst_51 = arith.constant dense<0.000000e+00> : vector<8x384xf32>
    %155 = tpu.matmul %154, %0, %cst_51 {dimension_numbers = #tpu.dot_dimension_numbers<[1], [0], [0], [1], [0, 0, 1, 1], [], []>} : vector<8x16xf32>, vector<16x384xf32>, vector<8x384xf32> -> vector<8x384xf32>
    %156 = vector.broadcast %2 : vector<1x384xf32> to vector<8x384xf32>
    %157 = arith.addf %155, %156 : vector<8x384xf32>
    %cst_52 = arith.constant dense<0.000000e+00> : vector<8x384xf32>
    %158 = tpu.matmul %149, %1, %cst_52 {dimension_numbers = #tpu.dot_dimension_numbers<[1], [0], [0], [1], [0, 0, 1, 1], [], []>} : vector<8x128xf32>, vector<128x384xf32>, vector<8x384xf32> -> vector<8x384xf32>
    %159 = vector.broadcast %3 : vector<1x384xf32> to vector<8x384xf32>
    %160 = arith.addf %158, %159 : vector<8x384xf32>
    %161 = vector.extract_strided_slice %157 {offsets = [0, 0], sizes = [8, 128], strides = [1, 1]} : vector<8x384xf32> to vector<8x128xf32>
    %162 = vector.extract_strided_slice %157 {offsets = [0, 128], sizes = [8, 128], strides = [1, 1]} : vector<8x384xf32> to vector<8x128xf32>
    %163 = vector.extract_strided_slice %157 {offsets = [0, 256], sizes = [8, 128], strides = [1, 1]} : vector<8x384xf32> to vector<8x128xf32>
    %164 = vector.extract_strided_slice %160 {offsets = [0, 0], sizes = [8, 128], strides = [1, 1]} : vector<8x384xf32> to vector<8x128xf32>
    %165 = vector.extract_strided_slice %160 {offsets = [0, 128], sizes = [8, 128], strides = [1, 1]} : vector<8x384xf32> to vector<8x128xf32>
    %166 = vector.extract_strided_slice %160 {offsets = [0, 256], sizes = [8, 128], strides = [1, 1]} : vector<8x384xf32> to vector<8x128xf32>
    %167 = arith.addf %161, %164 : vector<8x128xf32>
    %168 = arith.negf %167 : vector<8x128xf32>
    %169 = math.exp %168 : vector<8x128xf32>
    %cst_53 = arith.constant 1.000000e+00 : f32
    %170 = vector.broadcast %cst_53 : f32 to vector<8x128xf32>
    %171 = arith.addf %170, %169 : vector<8x128xf32>
    %172 = arith.divf %170, %171 : vector<8x128xf32>
    %173 = arith.addf %162, %165 : vector<8x128xf32>
    %174 = arith.negf %173 : vector<8x128xf32>
    %175 = math.exp %174 : vector<8x128xf32>
    %cst_54 = arith.constant 1.000000e+00 : f32
    %176 = vector.broadcast %cst_54 : f32 to vector<8x128xf32>
    %177 = arith.addf %176, %175 : vector<8x128xf32>
    %178 = arith.divf %176, %177 : vector<8x128xf32>
    %179 = arith.mulf %172, %166 : vector<8x128xf32>
    %180 = arith.addf %163, %179 : vector<8x128xf32>
    %181 = math.tanh %180 : vector<8x128xf32>
    %cst_55 = arith.constant 1.000000e+00 : f32
    %182 = vector.broadcast %cst_55 : f32 to vector<8x128xf32>
    %183 = arith.subf %182, %178 : vector<8x128xf32>
    %184 = arith.mulf %183, %181 : vector<8x128xf32>
    %185 = arith.mulf %178, %149 : vector<8x128xf32>
    %186 = arith.addf %184, %185 : vector<8x128xf32>
    %c4_56 = arith.constant 4 : index
    %c0_57 = arith.constant 0 : index
    %c0_58 = arith.constant 0 : index
    %187 = vector.load %arg11[%c4_56, %c0_57, %c0_58] : memref<8x8x128xf32, #tpu.memory_space<vmem>>, vector<1x8x128xf32>
    %188 = vector.shape_cast %187 : vector<1x8x128xf32> to vector<8x128xf32>
    %189 = vector.shape_cast %186 : vector<8x128xf32> to vector<1x8x128xf32>
    tpu.vector_store %arg11[%c4_56, %c0_57, %c0_58], %189 {strides = array<i32>} : memref<8x8x128xf32, #tpu.memory_space<vmem>>, vector<1x8x128xf32>,
    %c5 = arith.constant 5 : index
    %c0_59 = arith.constant 0 : index
    %c0_60 = arith.constant 0 : index
    %190 = vector.load %arg1[%c5, %c0_59, %c0_60] : memref<8x8x16xf32, #tpu.memory_space<vmem>>, vector<1x8x16xf32>
    %191 = vector.shape_cast %190 : vector<1x8x16xf32> to vector<8x16xf32>
    %cst_61 = arith.constant dense<0.000000e+00> : vector<8x384xf32>
    %192 = tpu.matmul %191, %0, %cst_61 {dimension_numbers = #tpu.dot_dimension_numbers<[1], [0], [0], [1], [0, 0, 1, 1], [], []>} : vector<8x16xf32>, vector<16x384xf32>, vector<8x384xf32> -> vector<8x384xf32>
    %193 = vector.broadcast %2 : vector<1x384xf32> to vector<8x384xf32>
    %194 = arith.addf %192, %193 : vector<8x384xf32>
    %cst_62 = arith.constant dense<0.000000e+00> : vector<8x384xf32>
    %195 = tpu.matmul %186, %1, %cst_62 {dimension_numbers = #tpu.dot_dimension_numbers<[1], [0], [0], [1], [0, 0, 1, 1], [], []>} : vector<8x128xf32>, vector<128x384xf32>, vector<8x384xf32> -> vector<8x384xf32>
    %196 = vector.broadcast %3 : vector<1x384xf32> to vector<8x384xf32>
    %197 = arith.addf %195, %196 : vector<8x384xf32>
    %198 = vector.extract_strided_slice %194 {offsets = [0, 0], sizes = [8, 128], strides = [1, 1]} : vector<8x384xf32> to vector<8x128xf32>
    %199 = vector.extract_strided_slice %194 {offsets = [0, 128], sizes = [8, 128], strides = [1, 1]} : vector<8x384xf32> to vector<8x128xf32>
    %200 = vector.extract_strided_slice %194 {offsets = [0, 256], sizes = [8, 128], strides = [1, 1]} : vector<8x384xf32> to vector<8x128xf32>
    %201 = vector.extract_strided_slice %197 {offsets = [0, 0], sizes = [8, 128], strides = [1, 1]} : vector<8x384xf32> to vector<8x128xf32>
    %202 = vector.extract_strided_slice %197 {offsets = [0, 128], sizes = [8, 128], strides = [1, 1]} : vector<8x384xf32> to vector<8x128xf32>
    %203 = vector.extract_strided_slice %197 {offsets = [0, 256], sizes = [8, 128], strides = [1, 1]} : vector<8x384xf32> to vector<8x128xf32>
    %204 = arith.addf %198, %201 : vector<8x128xf32>
    %205 = arith.negf %204 : vector<8x128xf32>
    %206 = math.exp %205 : vector<8x128xf32>
    %cst_63 = arith.constant 1.000000e+00 : f32
    %207 = vector.broadcast %cst_63 : f32 to vector<8x128xf32>
    %208 = arith.addf %207, %206 : vector<8x128xf32>
    %209 = arith.divf %207, %208 : vector<8x128xf32>
    %210 = arith.addf %199, %202 : vector<8x128xf32>
    %211 = arith.negf %210 : vector<8x128xf32>
    %212 = math.exp %211 : vector<8x128xf32>
    %cst_64 = arith.constant 1.000000e+00 : f32
    %213 = vector.broadcast %cst_64 : f32 to vector<8x128xf32>
    %214 = arith.addf %213, %212 : vector<8x128xf32>
    %215 = arith.divf %213, %214 : vector<8x128xf32>
    %216 = arith.mulf %209, %203 : vector<8x128xf32>
    %217 = arith.addf %200, %216 : vector<8x128xf32>
    %218 = math.tanh %217 : vector<8x128xf32>
    %cst_65 = arith.constant 1.000000e+00 : f32
    %219 = vector.broadcast %cst_65 : f32 to vector<8x128xf32>
    %220 = arith.subf %219, %215 : vector<8x128xf32>
    %221 = arith.mulf %220, %218 : vector<8x128xf32>
    %222 = arith.mulf %215, %186 : vector<8x128xf32>
    %223 = arith.addf %221, %222 : vector<8x128xf32>
    %c5_66 = arith.constant 5 : index
    %c0_67 = arith.constant 0 : index
    %c0_68 = arith.constant 0 : index
    %224 = vector.load %arg11[%c5_66, %c0_67, %c0_68] : memref<8x8x128xf32, #tpu.memory_space<vmem>>, vector<1x8x128xf32>
    %225 = vector.shape_cast %224 : vector<1x8x128xf32> to vector<8x128xf32>
    %226 = vector.shape_cast %223 : vector<8x128xf32> to vector<1x8x128xf32>
    tpu.vector_store %arg11[%c5_66, %c0_67, %c0_68], %226 {strides = array<i32>} : memref<8x8x128xf32, #tpu.memory_space<vmem>>, vector<1x8x128xf32>,
    %c6 = arith.constant 6 : index
    %c0_69 = arith.constant 0 : index
    %c0_70 = arith.constant 0 : index
    %227 = vector.load %arg1[%c6, %c0_69, %c0_70] : memref<8x8x16xf32, #tpu.memory_space<vmem>>, vector<1x8x16xf32>
    %228 = vector.shape_cast %227 : vector<1x8x16xf32> to vector<8x16xf32>
    %cst_71 = arith.constant dense<0.000000e+00> : vector<8x384xf32>
    %229 = tpu.matmul %228, %0, %cst_71 {dimension_numbers = #tpu.dot_dimension_numbers<[1], [0], [0], [1], [0, 0, 1, 1], [], []>} : vector<8x16xf32>, vector<16x384xf32>, vector<8x384xf32> -> vector<8x384xf32>
    %230 = vector.broadcast %2 : vector<1x384xf32> to vector<8x384xf32>
    %231 = arith.addf %229, %230 : vector<8x384xf32>
    %cst_72 = arith.constant dense<0.000000e+00> : vector<8x384xf32>
    %232 = tpu.matmul %223, %1, %cst_72 {dimension_numbers = #tpu.dot_dimension_numbers<[1], [0], [0], [1], [0, 0, 1, 1], [], []>} : vector<8x128xf32>, vector<128x384xf32>, vector<8x384xf32> -> vector<8x384xf32>
    %233 = vector.broadcast %3 : vector<1x384xf32> to vector<8x384xf32>
    %234 = arith.addf %232, %233 : vector<8x384xf32>
    %235 = vector.extract_strided_slice %231 {offsets = [0, 0], sizes = [8, 128], strides = [1, 1]} : vector<8x384xf32> to vector<8x128xf32>
    %236 = vector.extract_strided_slice %231 {offsets = [0, 128], sizes = [8, 128], strides = [1, 1]} : vector<8x384xf32> to vector<8x128xf32>
    %237 = vector.extract_strided_slice %231 {offsets = [0, 256], sizes = [8, 128], strides = [1, 1]} : vector<8x384xf32> to vector<8x128xf32>
    %238 = vector.extract_strided_slice %234 {offsets = [0, 0], sizes = [8, 128], strides = [1, 1]} : vector<8x384xf32> to vector<8x128xf32>
    %239 = vector.extract_strided_slice %234 {offsets = [0, 128], sizes = [8, 128], strides = [1, 1]} : vector<8x384xf32> to vector<8x128xf32>
    %240 = vector.extract_strided_slice %234 {offsets = [0, 256], sizes = [8, 128], strides = [1, 1]} : vector<8x384xf32> to vector<8x128xf32>
    %241 = arith.addf %235, %238 : vector<8x128xf32>
    %242 = arith.negf %241 : vector<8x128xf32>
    %243 = math.exp %242 : vector<8x128xf32>
    %cst_73 = arith.constant 1.000000e+00 : f32
    %244 = vector.broadcast %cst_73 : f32 to vector<8x128xf32>
    %245 = arith.addf %244, %243 : vector<8x128xf32>
    %246 = arith.divf %244, %245 : vector<8x128xf32>
    %247 = arith.addf %236, %239 : vector<8x128xf32>
    %248 = arith.negf %247 : vector<8x128xf32>
    %249 = math.exp %248 : vector<8x128xf32>
    %cst_74 = arith.constant 1.000000e+00 : f32
    %250 = vector.broadcast %cst_74 : f32 to vector<8x128xf32>
    %251 = arith.addf %250, %249 : vector<8x128xf32>
    %252 = arith.divf %250, %251 : vector<8x128xf32>
    %253 = arith.mulf %246, %240 : vector<8x128xf32>
    %254 = arith.addf %237, %253 : vector<8x128xf32>
    %255 = math.tanh %254 : vector<8x128xf32>
    %cst_75 = arith.constant 1.000000e+00 : f32
    %256 = vector.broadcast %cst_75 : f32 to vector<8x128xf32>
    %257 = arith.subf %256, %252 : vector<8x128xf32>
    %258 = arith.mulf %257, %255 : vector<8x128xf32>
    %259 = arith.mulf %252, %223 : vector<8x128xf32>
    %260 = arith.addf %258, %259 : vector<8x128xf32>
    %c6_76 = arith.constant 6 : index
    %c0_77 = arith.constant 0 : index
    %c0_78 = arith.constant 0 : index
    %261 = vector.load %arg11[%c6_76, %c0_77, %c0_78] : memref<8x8x128xf32, #tpu.memory_space<vmem>>, vector<1x8x128xf32>
    %262 = vector.shape_cast %261 : vector<1x8x128xf32> to vector<8x128xf32>
    %263 = vector.shape_cast %260 : vector<8x128xf32> to vector<1x8x128xf32>
    tpu.vector_store %arg11[%c6_76, %c0_77, %c0_78], %263 {strides = array<i32>} : memref<8x8x128xf32, #tpu.memory_space<vmem>>, vector<1x8x128xf32>,
    %c7 = arith.constant 7 : index
    %c0_79 = arith.constant 0 : index
    %c0_80 = arith.constant 0 : index
    %264 = vector.load %arg1[%c7, %c0_79, %c0_80] : memref<8x8x16xf32, #tpu.memory_space<vmem>>, vector<1x8x16xf32>
    %265 = vector.shape_cast %264 : vector<1x8x16xf32> to vector<8x16xf32>
    %cst_81 = arith.constant dense<0.000000e+00> : vector<8x384xf32>
    %266 = tpu.matmul %265, %0, %cst_81 {dimension_numbers = #tpu.dot_dimension_numbers<[1], [0], [0], [1], [0, 0, 1, 1], [], []>} : vector<8x16xf32>, vector<16x384xf32>, vector<8x384xf32> -> vector<8x384xf32>
    %267 = vector.broadcast %2 : vector<1x384xf32> to vector<8x384xf32>
    %268 = arith.addf %266, %267 : vector<8x384xf32>
    %cst_82 = arith.constant dense<0.000000e+00> : vector<8x384xf32>
    %269 = tpu.matmul %260, %1, %cst_82 {dimension_numbers = #tpu.dot_dimension_numbers<[1], [0], [0], [1], [0, 0, 1, 1], [], []>} : vector<8x128xf32>, vector<128x384xf32>, vector<8x384xf32> -> vector<8x384xf32>
    %270 = vector.broadcast %3 : vector<1x384xf32> to vector<8x384xf32>
    %271 = arith.addf %269, %270 : vector<8x384xf32>
    %272 = vector.extract_strided_slice %268 {offsets = [0, 0], sizes = [8, 128], strides = [1, 1]} : vector<8x384xf32> to vector<8x128xf32>
    %273 = vector.extract_strided_slice %268 {offsets = [0, 128], sizes = [8, 128], strides = [1, 1]} : vector<8x384xf32> to vector<8x128xf32>
    %274 = vector.extract_strided_slice %268 {offsets = [0, 256], sizes = [8, 128], strides = [1, 1]} : vector<8x384xf32> to vector<8x128xf32>
    %275 = vector.extract_strided_slice %271 {offsets = [0, 0], sizes = [8, 128], strides = [1, 1]} : vector<8x384xf32> to vector<8x128xf32>
    %276 = vector.extract_strided_slice %271 {offsets = [0, 128], sizes = [8, 128], strides = [1, 1]} : vector<8x384xf32> to vector<8x128xf32>
    %277 = vector.extract_strided_slice %271 {offsets = [0, 256], sizes = [8, 128], strides = [1, 1]} : vector<8x384xf32> to vector<8x128xf32>
    %278 = arith.addf %272, %275 : vector<8x128xf32>
    %279 = arith.negf %278 : vector<8x128xf32>
    %280 = math.exp %279 : vector<8x128xf32>
    %cst_83 = arith.constant 1.000000e+00 : f32
    %281 = vector.broadcast %cst_83 : f32 to vector<8x128xf32>
    %282 = arith.addf %281, %280 : vector<8x128xf32>
    %283 = arith.divf %281, %282 : vector<8x128xf32>
    %284 = arith.addf %273, %276 : vector<8x128xf32>
    %285 = arith.negf %284 : vector<8x128xf32>
    %286 = math.exp %285 : vector<8x128xf32>
    %cst_84 = arith.constant 1.000000e+00 : f32
    %287 = vector.broadcast %cst_84 : f32 to vector<8x128xf32>
    %288 = arith.addf %287, %286 : vector<8x128xf32>
    %289 = arith.divf %287, %288 : vector<8x128xf32>
    %290 = arith.mulf %283, %277 : vector<8x128xf32>
    %291 = arith.addf %274, %290 : vector<8x128xf32>
    %292 = math.tanh %291 : vector<8x128xf32>
    %cst_85 = arith.constant 1.000000e+00 : f32
    %293 = vector.broadcast %cst_85 : f32 to vector<8x128xf32>
    %294 = arith.subf %293, %289 : vector<8x128xf32>
    %295 = arith.mulf %294, %292 : vector<8x128xf32>
    %296 = arith.mulf %289, %260 : vector<8x128xf32>
    %297 = arith.addf %295, %296 : vector<8x128xf32>
    %c7_86 = arith.constant 7 : index
    %c0_87 = arith.constant 0 : index
    %c0_88 = arith.constant 0 : index
    %298 = vector.load %arg11[%c7_86, %c0_87, %c0_88] : memref<8x8x128xf32, #tpu.memory_space<vmem>>, vector<1x8x128xf32>
    %299 = vector.shape_cast %298 : vector<1x8x128xf32> to vector<8x128xf32>
    %300 = vector.shape_cast %297 : vector<8x128xf32> to vector<1x8x128xf32>
    tpu.vector_store %arg11[%c7_86, %c0_87, %c0_88], %300 {strides = array<i32>} : memref<8x8x128xf32, #tpu.memory_space<vmem>>, vector<1x8x128xf32>,
    %c0_89 = arith.constant 0 : index
    %c0_90 = arith.constant 0 : index
    %301 = vector.load %arg10[%c0_89, %c0_90] : memref<8x128xf32, #tpu.memory_space<vmem>>, vector<8x128xf32>
    tpu.vector_store %arg10[%c0_89, %c0_90], %297 {strides = array<i32>} : memref<8x128xf32, #tpu.memory_space<vmem>>, vector<8x128xf32>,
    %c0_91 = arith.constant 0 : index
    %c0_92 = arith.constant 0 : index
    %c0_93 = arith.constant 0 : index
    %302 = vector.load %arg11[%c0_91, %c0_92, %c0_93] : memref<8x8x128xf32, #tpu.memory_space<vmem>>, vector<8x8x128xf32>
    %303 = vector.shape_cast %302 : vector<8x8x128xf32> to vector<64x128xf32>
    %c0_94 = arith.constant 0 : index
    %c0_95 = arith.constant 0 : index
    %304 = vector.load %arg7[%c0_94, %c0_95] : memref<128x128xf32, #tpu.memory_space<vmem>>, vector<128x128xf32>
    %cst_96 = arith.constant dense<0.000000e+00> : vector<64x128xf32>
    %305 = tpu.matmul %303, %304, %cst_96 {dimension_numbers = #tpu.dot_dimension_numbers<[1], [0], [0], [1], [0, 0, 1, 1], [], []>} : vector<64x128xf32>, vector<128x128xf32>, vector<64x128xf32> -> vector<64x128xf32>
    %c0_97 = arith.constant 0 : index
    %c0_98 = arith.constant 0 : index
    %306 = vector.load %arg8[%c0_97, %c0_98] : memref<1x128xf32, #tpu.memory_space<vmem>>, vector<1x128xf32>
    %307 = vector.broadcast %306 : vector<1x128xf32> to vector<64x128xf32>
    %308 = arith.addf %305, %307 : vector<64x128xf32>
    %309 = vector.shape_cast %308 : vector<64x128xf32> to vector<8x8x128xf32>
    %c0_99 = arith.constant 0 : index
    %c0_100 = arith.constant 0 : index
    %c0_101 = arith.constant 0 : index
    %310 = vector.load %arg9[%c0_99, %c0_100, %c0_101] : memref<8x8x128xf32, #tpu.memory_space<vmem>>, vector<8x8x128xf32>
    tpu.vector_store %arg9[%c0_99, %c0_100, %c0_101], %309 {strides = array<i32>} : memref<8x8x128xf32, #tpu.memory_space<vmem>>, vector<8x8x128xf32>,
    return
  }
  func.func @transform_0(%arg0: i32) -> (i32, i32, i32) {
    %c0_i32 = arith.constant 0 : i32
    %c0_i32_0 = arith.constant 0 : i32
    %c0_i32_1 = arith.constant 0 : i32
    %c0_i32_2 = arith.constant 0 : i32
    return %c0_i32, %c0_i32_0, %c0_i32_1 : i32, i32, i32
  }
  func.func @transform_1(%arg0: i32) -> (i32, i32) {
    %c0_i32 = arith.constant 0 : i32
    %c0_i32_0 = arith.constant 0 : i32
    %c0_i32_1 = arith.constant 0 : i32
    return %c0_i32, %c0_i32_0 : i32, i32
  }
  func.func @transform_2(%arg0: i32) -> (i32, i32) {
    %c0_i32 = arith.constant 0 : i32
    %c0_i32_0 = arith.constant 0 : i32
    %c0_i32_1 = arith.constant 0 : i32
    return %c0_i32, %c0_i32_0 : i32, i32
  }
  func.func @transform_3(%arg0: i32) -> (i32, i32) {
    %c0_i32 = arith.constant 0 : i32
    %c0_i32_0 = arith.constant 0 : i32
    %c0_i32_1 = arith.constant 0 : i32
    return %c0_i32, %c0_i32_0 : i32, i32
  }
  func.func @transform_4(%arg0: i32) -> (i32, i32) {
    %c0_i32 = arith.constant 0 : i32
    %c0_i32_0 = arith.constant 0 : i32
    %c0_i32_1 = arith.constant 0 : i32
    return %c0_i32, %c0_i32_0 : i32, i32
  }
  func.func @transform_5(%arg0: i32) -> (i32, i32) {
    %c0_i32 = arith.constant 0 : i32
    %c0_i32_0 = arith.constant 0 : i32
    %c0_i32_1 = arith.constant 0 : i32
    return %c0_i32, %c0_i32_0 : i32, i32
  }
  func.func @transform_6(%arg0: i32) -> (i32, i32) {
    %c0_i32 = arith.constant 0 : i32
    %c0_i32_0 = arith.constant 0 : i32
    %c0_i32_1 = arith.constant 0 : i32
    return %c0_i32, %c0_i32_0 : i32, i32
  }
  func.func @transform_7(%arg0: i32) -> (i32, i32) {
    %c0_i32 = arith.constant 0 : i32
    %c0_i32_0 = arith.constant 0 : i32
    %c0_i32_1 = arith.constant 0 : i32
    return %c0_i32, %c0_i32_0 : i32, i32
  }
  func.func @transform_8(%arg0: i32) -> (i32, i32, i32) {
    %c0_i32 = arith.constant 0 : i32
    %c0_i32_0 = arith.constant 0 : i32
    %c0_i32_1 = arith.constant 0 : i32
    %c0_i32_2 = arith.constant 0 : i32
    return %c0_i32, %c0_i32_0, %c0_i32_1 : i32, i32, i32
  }
  func.func @transform_9(%arg0: i32) -> (i32, i32) {
    %c0_i32 = arith.constant 0 : i32
    %c0_i32_0 = arith.constant 0 : i32
    %c0_i32_1 = arith.constant 0 : i32
    return %c0_i32, %c0_i32_0 : i32, i32
  }
}

</mosaic_0001>

<bundles_post_ra>
// kernel: tpu_custom_call.1
= control target key start
LH: loop header
LB: loop body
LE: loop exit
PB: predicated region body
PF: predicated region fallthrough
CT: control target
= control target key end

     0   :  { %15 = vsyncpa [#allocation4], 0  ;;  %s4963_s0 = inlined_call_operand.hbm [shape: f32[8,8,16], index: 0, kind: input, shape index: {}]   ;;  %s4964_s1 = inlined_call_operand.hbm [shape: f32[8,128], index: 1, kind: input, shape index: {}]   ;;  %s4965_s2 = inlined_call_operand.hbm [shape: f32[16,384], index: 2, kind: input, shape index: {}]   ;;  %s4966_s3 = inlined_call_operand.hbm [shape: f32[128,384], index: 3, kind: input, shape index: {}]   ;;  %s4967_s4 = inlined_call_operand.vmem [shape: f32[1,384], index: 4, kind: input, shape index: {}]   ;;  %s4968_s5 = inlined_call_operand.vmem [shape: f32[1,384], index: 5, kind: input, shape index: {}]   ;;  %s4969_s6 = inlined_call_operand.hbm [shape: f32[128,128], index: 6, kind: input, shape index: {}]   ;;  %s4970_s7 = inlined_call_operand.vmem [shape: f32[1,128], index: 7, kind: input, shape index: {}]   ;;  %s4971_s8 = inlined_call_operand.hbm [shape: f32[8,8,128], index: 8, kind: output, shape index: {0}]   ;;  %s4972_s9 = inlined_call_operand.hbm [shape: f32[8,128], index: 9, kind: output, shape index: {1}]  }
   0x1   :  { %16 = vsyncpa [#allocation7], 0 }
   0x2   :  { %17 = vsyncpa [#allocation10], 0 }
   0x3   :  { %18 = vsyncpa [#allocation5], 0 }
   0x4   :  { %19 = vsyncpa [#allocation14], 0  ;;  %s4284_s30 = smov [#allocation6]   ;;  %s4120_s13 = scalar_lea.hbm %s4964_s1, 128 }
   0x5   :  { %s38_s10 = sshll.u32 %s4284_s30, 4  ;;  %p4121_p0 = scmp.ne.s32.totalorder %s4964_s1, %s4120_s13  ;;  %s39_s10 = int_to_ptr.vmem [resolvable:$true] %s38_s10 }
   0x6   :  { %p4124_p1 = scmp.lt.u32.totalorder %s4120_s13, %s4964_s1 }
   0x8   :  { %p4126_p2 = pnand %p4124_p1, %p4121_p0 }
   0xa   :  { %4129 = shalt.err (!%p4126_p2)
}
   0xb   :  { %s4130_s18 = scalar_lea.vmem %s39_s10, 128  ;;  %p4135_p4 = scmp.lt.s32.totalorder %s39_s10, %s39_s10 }
   0xc   :  { %p4131_p3 = scmp.ne.s32.totalorder %s39_s10, %s4130_s18  ;;  %p4136_p5 = scmp.lt.s32.totalorder %s4130_s18, %s4130_s18 }
   0xe   :  { %p4137_p6 = por %p4136_p5, %p4135_p4 }
  0x10   :  { %p4138_p7 = pnand %p4137_p6, %p4131_p3 }
  0x12   :  { %4141 = shalt.err (!%p4138_p7)
}
  0x13   :  { %41 = dma.hbm_to_vmem [thread:$0]  %s4964_s1, 128, %s39_s10, [#allocation7]  }
  0x14   :  { %s4285_s21 = smov [#allocation9]   ;;  %s4286_s23 = smov [#allocation3]  }
  0x15   :  { %s59_s22 = sshll.u32 %s4285_s21, 4  ;;  %s25_s24 = sshll.u32 %s4286_s23, 4  ;;  %s60_s22 = int_to_ptr.vmem [resolvable:$true] %s59_s22  ;;  %s26_s24 = int_to_ptr.vmem [resolvable:$true] %s25_s24 }
  0x16   :  { %s4142_s27 = scalar_lea.hbm %s4966_s3, 6144 }
  0x17   :  { %p4143_p8 = scmp.ne.s32.totalorder %s4966_s3, %s4142_s27  ;;  %p4146_p9 = scmp.lt.u32.totalorder %s4142_s27, %s4966_s3 }
  0x19   :  { %p4148_p10 = pnand %p4146_p9, %p4143_p8 }
  0x1b   :  { %4151 = shalt.err (!%p4148_p10)
}
  0x1c   :  { %s4152_s1 = scalar_lea.vmem %s60_s22, 6144  ;;  %p4157_p12 = scmp.lt.s32.totalorder %s60_s22, %s60_s22 }
  0x1d   :  { %p4153_p11 = scmp.ne.s32.totalorder %s60_s22, %s4152_s1  ;;  %p4158_p13 = scmp.lt.s32.totalorder %s4152_s1, %s4152_s1 }
  0x1f   :  { %p4159_p0 = por %p4158_p13, %p4157_p12 }
  0x21   :  { %p4160_p1 = pnand %p4159_p0, %p4153_p11 }
  0x23   :  { %4163 = shalt.err (!%p4160_p1)
}
  0x24   :  { %s4287_s10 = smov 384   ;;  %s4288_s12 = smov 24  }
  0x25   :  { %65 = dma.hbm_to_vmem [thread:$0]  %s4966_s3, 6144, %s60_s22, [#allocation10], %s4287_s10, %s4287_s10, %s4288_s12  }
  0x26   :  { %s4164_s17 = scalar_lea.hbm %s4963_s0, 1024 }
  0x27   :  { %p4165_p2 = scmp.ne.s32.totalorder %s4963_s0, %s4164_s17  ;;  %p4168_p3 = scmp.lt.u32.totalorder %s4164_s17, %s4963_s0 }
  0x29   :  { %p4170_p4 = pnand %p4168_p3, %p4165_p2 }
  0x2b   :  { %4173 = shalt.err (!%p4170_p4)
}
  0x2c   :  { %s4174_s23 = scalar_lea.vmem %s26_s24, 1024  ;;  %p4179_p6 = scmp.lt.s32.totalorder %s26_s24, %s26_s24 }
  0x2d   :  { %p4175_p5 = scmp.ne.s32.totalorder %s26_s24, %s4174_s23  ;;  %p4180_p7 = scmp.lt.s32.totalorder %s4174_s23, %s4174_s23 }
  0x2f   :  { %p4181_p8 = por %p4180_p7, %p4179_p6 }
  0x31   :  { %p4182_p9 = pnand %p4181_p8, %p4175_p5 }
  0x33   :  { %4185 = shalt.err (!%p4182_p9)
}
  0x34   :  { %s4289_s3 = smov 128   ;;  %s4290_s22 = smov 8  }
  0x35   :  { %31 = dma.hbm_to_vmem [thread:$0]  %s4963_s0, 1024, %s26_s24, [#allocation4], %s4289_s3, %s4289_s3, %s4290_s22  }
  0x36   :  { %s4291_s27 = smov [#allocation8]   ;;  %s4292_s29 = smov [#allocation11]  }
  0x37   :  { %s47_s28 = sshll.u32 %s4291_s27, 4  ;;  %s75_s30 = sshll.u32 %s4292_s29, 4  ;;  %s48_s28 = int_to_ptr.vmem [resolvable:$true] %s47_s28  ;;  %s76_s30 = int_to_ptr.vmem [resolvable:$true] %s75_s30 }
  0x38   :  { %s4186_s13 = scalar_lea.hbm %s4965_s2, 768 }
  0x39   :  { %p4187_p10 = scmp.ne.s32.totalorder %s4965_s2, %s4186_s13  ;;  %p4190_p11 = scmp.lt.u32.totalorder %s4186_s13, %s4965_s2 }
  0x3b   :  { %p4192_p12 = pnand %p4190_p11, %p4187_p10 }
  0x3d   :  { %4195 = shalt.err (!%p4192_p12)
}
  0x3e   :  { %s4196_s0 = scalar_lea.vmem %s48_s28, 768  ;;  %p4201_p0 = scmp.lt.s32.totalorder %s48_s28, %s48_s28 }
  0x3f   :  { %p4197_p13 = scmp.ne.s32.totalorder %s48_s28, %s4196_s0  ;;  %p4202_p1 = scmp.lt.s32.totalorder %s4196_s0, %s4196_s0 }
  0x41   :  { %p4203_p2 = por %p4202_p1, %p4201_p0 }
  0x43   :  { %p4204_p3 = pnand %p4203_p2, %p4197_p13 }
  0x45   :  { %4207 = shalt.err (!%p4204_p3)
}
  0x46   :  { %53 = dma.hbm_to_vmem [thread:$0]  %s4965_s2, 768, %s48_s28, [#allocation7], %s4287_s10, %s4287_s10, %s4288_s12  }
  0x47   :  { %s4208_s21 = scalar_lea.hbm %s4969_s6, 2048 }
  0x48   :  { %p4209_p4 = scmp.ne.s32.totalorder %s4969_s6, %s4208_s21  ;;  %p4212_p5 = scmp.lt.u32.totalorder %s4208_s21, %s4969_s6 }
  0x4a   :  { %p4214_p6 = pnand %p4212_p5, %p4209_p4 }
  0x4c   :  { %4217 = shalt.err (!%p4214_p6)
}
  0x4d   :  { %s4218_s29 = scalar_lea.vmem %s76_s30, 2048  ;;  %p4223_p8 = scmp.lt.s32.totalorder %s76_s30, %s76_s30 }
  0x4e   :  { %p4219_p7 = scmp.ne.s32.totalorder %s76_s30, %s4218_s29  ;;  %p4224_p9 = scmp.lt.s32.totalorder %s4218_s29, %s4218_s29 }
  0x50   :  { %p4225_p10 = por %p4224_p9, %p4223_p8 }
  0x52   :  { %p4226_p11 = pnand %p4225_p10, %p4219_p7 }
  0x54   :  { %4229 = shalt.err (!%p4226_p11)
}
  0x55   :  { %81 = dma.hbm_to_vmem [thread:$0]  %s4969_s6, 2048, %s76_s30, [#allocation10], %s4289_s3, %s4289_s3, %s4290_s22  }
  0x56   :  { %4274 = dma.done.wait [#allocation4], 1024  }
  0x57   :  { %4275 = vsyncadd [#allocation4], 4294966272 }
  0x58   :  { %4276 = dma.done.wait [#allocation7], 896  }
  0x59   :  { %4277 = vsyncadd [#allocation7], 4294966400 }
  0x5a   :  { %4278 = dma.done.wait [#allocation10], 8192  }
  0x5b   :  { %4279 = vsyncadd [#allocation10], 4294959104  ;;  %v4293_v0 = vmov 0.0   ;;  %v106_v1 = vld [vmem:[#allocation9 + $0x8] sm:$0xff]  ;;  %v109_v2 = vld [vmem:[#allocation9 + $0x20] sm:$0xff]  ;;  %vm173_vm0 = vcmask 130048  }
  0x5c   :  { %241 = vmatprep.mubr.f32.mxu0 %v4293_v0  ;;  %398 = vmatprep.mubr.f32.mxu1 %v4293_v0  ;;  %v105_v3 = vld [vmem:[#allocation9] sm:$0xff]  ;;  %v4422_v4 = vpack.c.bf16 %v109_v2, %v106_v1  ;;  %v108_v5 = vld [vmem:[#allocation9 + $0x18] sm:$0xff]  ;;  %v115_v7 = vld [vmem:[#allocation9 + $0x50] sm:$0xff]  ;;  %v4294_v37 = vmov 0.0|0.0   ;;  %vm4295_vm1 = vmmov 0  }
  0x5d   :  { %v112_v6 = vld [vmem:[#allocation9 + $0x38] sm:$0xff]  ;;  %v4424_v8 = vpack.c.bf16 %v108_v5, %v105_v3  ;;  %v111_v10 = vld [vmem:[#allocation9 + $0x30] sm:$0xff]  ;;  %v114_v11 = vld [vmem:[#allocation9 + $0x48] sm:$0xff] }
  0x5e   :  { %v4426_v9 = vpack.c.bf16 %v115_v7, %v112_v6  ;;  %v118_v12 = vld [vmem:[#allocation9 + $0x68] sm:$0xff]  ;;  %3450 = vmatprep.subr.bf16.mxu1 %v4422_v4  ;;  %v121_v13 = vld [vmem:[#allocation9 + $0x80] sm:$0xff]  ;;  %v4430_v14 = vpack.c.bf16 %v114_v11, %v111_v10  ;;  %v120_v17 = vld [vmem:[#allocation9 + $0x78] sm:$0xff] }
  0x5f   :  { %3452 = vmatpush1.bf16.msra.mxu1 %v4424_v8  ;;  %v4433_v15 = vpack.c.bf16 %v121_v13, %v118_v12  ;;  %v117_v16 = vld [vmem:[#allocation9 + $0x60] sm:$0xff]  ;;  %v124_v18 = vld [vmem:[#allocation9 + $0x98] sm:$0xff]  ;;  %v127_v19 = vld [vmem:[#allocation9 + $0xb0] sm:$0xff] }
  0x60   :  { %3454 = vmatprep.subr.bf16.mxu1 %v4426_v9  ;;  %v4436_v20 = vpack.c.bf16 %v120_v17, %v117_v16  ;;  %v123_v21 = vld [vmem:[#allocation9 + $0x90] sm:$0xff]  ;;  %v100_v22 = vld [vmem:[#allocation8 + $0x8] sm:$0xff]  ;;  %v4439_v24 = vpack.c.bf16 %v127_v19, %v124_v18  ;;  %v126_v25 = vld [vmem:[#allocation9 + $0xa8] sm:$0xff] }
  0x61   :  { %v103_v23 = vld [vmem:[#allocation8 + $0x20] sm:$0xff]  ;;  %v102_v28 = vld [vmem:[#allocation8 + $0x18] sm:$0xff]  ;;  %v133_v30 = vld [vmem:[#allocation9 + $0xe0] sm:$0xff]  ;;  %v4447_v32 = vpack.c.bf16 %v126_v25, %v123_v21 }
  0x62   :  { %v4441_v26 = vpack.c.bf16 %v103_v23, %v100_v22  ;;  %v99_v27 = vld [vmem:[#allocation8] sm:$0xff]  ;;  %v130_v29 = vld [vmem:[#allocation9 + $0xc8] sm:$0xff]  ;;  %v129_v35 = vld [vmem:[#allocation9 + $0xc0] sm:$0xff] }
  0x63   :  { %3456 = vmatpush1.bf16.msra.mxu1 %v4430_v14  ;;  %v4443_v31 = vpack.c.bf16 %v102_v28, %v99_v27  ;;  %v156_v33 = vld [vmem:[#allocation3] sm:$0xff]  ;;  %v4451_v34 = vpack.c.bf16 %v133_v30, %v130_v29  ;;  %v132_v36 = vld [vmem:[#allocation9 + $0xd8] sm:$0xff]  ;;  %v139_v39 = vld [vmem:[#allocation9 + $0x110] sm:$0xff] }
  0x64   :  { %3458 = vmatprep.subr.bf16.mxu1 %v4433_v15  ;;  %3443 = vmatprep.subr.bf16.mxu0 %v4441_v26  ;;  %v136_v38 = vld [vmem:[#allocation9 + $0xf8] sm:$0xff]  ;;  %v4456_v40 = vpack.c.bf16 %v132_v36, %v129_v35  ;;  %v135_v42 = vld [vmem:[#allocation9 + $0xf0] sm:$0xff]  ;;  %v138_v43 = vld [vmem:[#allocation9 + $0x108] sm:$0xff] }
  0x65   :  { %3445 = vmatpush1.bf16.msra.mxu0 %v4443_v31  ;;  %v4461_v41 = vpack.c.bf16 %v139_v39, %v136_v38  ;;  %v142_v44 = vld [vmem:[#allocation9 + $0x128] sm:$0xff]  ;;  %v145_v45 = vld [vmem:[#allocation9 + $0x140] sm:$0xff]  ;;  %v104_v47 = vld [vmem:[#allocation8 + $0x28] sm:$0xff]  ;;  %v4466_v49 = vpack.c.bf16 %v138_v43, %v135_v42 }
  0x66   :  { %3446 = vmatprep.subr.bf16.mxu0 %v4294_v37  ;;  %v101_v46 = vld [vmem:[#allocation8 + $0x10] sm:$0xff]  ;;  %v4469_v50 = vpack.c.bf16 %v145_v45, %v142_v44  ;;  %v144_v52 = vld [vmem:[#allocation9 + $0x138] sm:$0xff]  ;;  %v151_v54 = vld [vmem:[#allocation9 + $0x170] sm:$0xff] }
  0x67   :  { %3460 = vmatpush1.bf16.msra.mxu1 %v4436_v20  ;;  %v4463_v48 = vpack.c.bf16 %v104_v47, %v101_v46  ;;  %v141_v51 = vld [vmem:[#allocation9 + $0x120] sm:$0xff]  ;;  %v148_v53 = vld [vmem:[#allocation9 + $0x158] sm:$0xff]  ;;  %v147_v57 = vld [vmem:[#allocation9 + $0x150] sm:$0xff] }
  0x68   :  { %3462 = vmatprep.subr.bf16.mxu1 %v4439_v24  ;;  %2845 = vmatmul.mubr.msk.f32.vlgmr.msra.gmra.mrb[0].mxu0 %vm173_vm0, %v156_v33  ;;  %v4474_v55 = vpack.c.bf16 %v144_v52, %v141_v51  ;;  %v4478_v56 = vpack.c.bf16 %v151_v54, %v148_v53  ;;  %v150_v58 = vld [vmem:[#allocation9 + $0x168] sm:$0xff]  ;;  %v107_v60 = vld [vmem:[#allocation9 + $0x10] sm:$0xff]  ;;  %v113_v1 = vld [vmem:[#allocation9 + $0x40] sm:$0xff] }
  0x69   :  { %3066 = vmatprep.mubr.msk.f32.mxu0 %vm4295_vm1, %v4293_v0  ;;  %3448 = vmatpush3.bf16.msra.mxu0 %v4463_v48  ;;  %v4484_v59 = vpack.c.bf16 %v150_v58, %v147_v57  ;;  %v110_v61 = vld [vmem:[#allocation9 + $0x28] sm:$0xff]  ;;  %v116_v2 = vld [vmem:[#allocation9 + $0x58] sm:$0xff]  ;;  %v119_v5 = vld [vmem:[#allocation9 + $0x70] sm:$0xff] }
  0x6a   :  { %3506 = vmatprep.subr.bf16.mxu0 %v4441_v26  ;;  %v4488_v62 = vld [vmem:[#allocation6] sm:$0xff]  ;;  %v4490_v63 = vpack.c.bf16 %v110_v61, %v107_v60  ;;  %v4495_v3 = vpack.c.bf16 %v116_v2, %v113_v1  ;;  %v125_v10 = vld [vmem:[#allocation9 + $0xa0] sm:$0xff]  ;;  %v128_v11 = vld [vmem:[#allocation9 + $0xb8] sm:$0xff] }
  0x6b   :  { %3464 = vmatpush1.bf16.msra.mxu1 %v4447_v32  ;;  %v122_v6 = vld [vmem:[#allocation9 + $0x88] sm:$0xff]  ;;  %v4505_v12 = vpack.c.bf16 %v128_v11, %v125_v10  ;;  %v131_v13 = vld [vmem:[#allocation9 + $0xd0] sm:$0xff]  ;;  %v137_v18 = vld [vmem:[#allocation9 + $0x100] sm:$0xff] }
  0x6c   :  { %3466 = vmatprep.subr.bf16.mxu1 %v4451_v34  ;;  %3067 = vmatmul.mubr.msk.f32.vlgmr.msra.gmra.mrb[2].mxu0 %vm173_vm0, %v156_v33  ;;  %v4501_v7 = vpack.c.bf16 %v122_v6, %v119_v5  ;;  %v134_v16 = vld [vmem:[#allocation9 + $0xe8] sm:$0xff]  ;;  %v140_v19 = vld [vmem:[#allocation9 + $0x118] sm:$0xff]  ;;  %v143_v22 = vld [vmem:[#allocation9 + $0x130] sm:$0xff]  ;;  %v158_v33 = vlaneseq }
  0x6d   :  { %3508 = vmatpush1.bf16.msra.mxu0 %v4443_v31  ;;  %566 = vmatprep.mubr.f32.mxu0 %v4293_v0  ;;  %v4509_v17 = vpack.c.bf16 %v134_v16, %v131_v13  ;;  %v4513_v21 = vpack.c.bf16 %v140_v19, %v137_v18  ;;  %v146_v23 = vld [vmem:[#allocation9 + $0x148] sm:$0xff]  ;;  %v149_v27 = vld [vmem:[#allocation9 + $0x160] sm:$0xff]  ;;  %v152_v28 = vld [vmem:[#allocation9 + $0x178] sm:$0xff] }
  0x6e   :  { %3509 = vmatprep.subr.bf16.mxu0 %v4294_v37  ;;  %v4517_v25 = vpack.c.bf16 %v146_v23, %v143_v22  ;;  %v4521_v29 = vpack.c.bf16 %v152_v28, %v149_v27  ;;  %v498_v30 = vld [vmem:[#allocation3 + $0x8] sm:$0xff]  ;;  %v159_v36 = vshrl.u32 %v158_v33, 7  ;;  %v153_v42 = vld [vmem:[%s4967_s4] sm:$0x7] }
  0x6f   :  { %3468 = vmatpush1.bf16.msra.mxu1 %v4456_v40  ;;  %v154_v46 = vld [vmem:[%s4968_s5] sm:$0x7] }
  0x70   :  { %3470 = vmatprep.subr.bf16.mxu1 %v4461_v41  ;;  %2849 = vmatmul.mubr.msk.f32.vlgmr.msra.gmra.mrb[4].mxu0 %vm173_vm0, %v498_v30  ;;  %v160_v39 = vsub.s32 0, %v159_v36  ;;  %v164_v43 = vsub.s32 1, %v159_v36  ;;  %v168_v16 = vsub.s32 2, %v159_v36 }
  0x71   :  { %3511 = vmatpush3.bf16.msra.mxu0 %v4463_v48  ;;  %3108 = vmatprep.mubr.msk.f32.mxu0 %vm4295_vm1, %v4293_v0 }
  0x72   :  { %3513 = vmatprep.subr.bf16.mxu0 %v4422_v4  ;;  %v4571_v44 = vrot.slane %v153_v42, %v160_v39  ;;  %v4576_v47 = vrot.slane %v153_v42, %v164_v43  ;;  %v4579_v53 = vrot.slane %v154_v46, %v160_v39  ;;  %v4582_v57 = vrot.slane %v154_v46, %v164_v43 }
  0x73   :  { %3472 = vmatpush1.bf16.msra.mxu1 %v4466_v49  ;;  %v4586_v19 = vrot.slane %v153_v42, %v168_v16  ;;  %v4588_v22 = vrot.slane %v154_v46, %v168_v16 }
  0x74   :  { %3474 = vmatprep.subr.bf16.mxu1 %v4469_v50  ;;  %3109 = vmatmul.mubr.msk.f32.vlgmr.msra.gmra.mrb[6].mxu0 %vm173_vm0, %v498_v30 }
  0x75   :  { %3515 = vmatpush1.bf16.msra.mxu0 %v4424_v8  ;;  %707 = vmatprep.mubr.f32.mxu0 %v4293_v0 }
  0x76   :  { %3517 = vmatprep.subr.bf16.mxu0 %v4426_v9 }
  0x77   :  { %3476 = vmatpush1.bf16.msra.mxu1 %v4474_v55 }
  0x78   :  { %3478 = vmatprep.subr.bf16.mxu1 %v4478_v56 }
  0x79   :  { %3519 = vmatpush1.bf16.msra.mxu0 %v4430_v14 }
  0x7a   :  { %3521 = vmatprep.subr.bf16.mxu0 %v4433_v15 }
  0x7b   :  { %3480 = vmatpush1.bf16.msra.mxu1 %v4484_v59 }
  0x7c   :  { %3481 = vmatprep.subr.bf16.mxu1 %v4294_v37 }
  0x7d   :  { %3523 = vmatpush1.bf16.msra.mxu0 %v4436_v20 }
  0x7e   :  { %399 = vmatmul.mubr.f32.vlgmr.msra.gmra.mrb[0].mxu1 %v4488_v62  ;;  %3525 = vmatprep.subr.bf16.mxu0 %v4439_v24 }
  0x7f   :  { %3483 = vmatpush3.bf16.msra.mxu1 %v4490_v63  ;;  %3101 = vmatprep.mubr.msk.f32.mxu1 %vm4295_vm1, %v4293_v0 }
  0x80   :  { %3484 = vmatprep.subr.bf16.mxu1 %v4294_v37 }
  0x81   :  { %3527 = vmatpush1.bf16.msra.mxu0 %v4447_v32 }
  0x82   :  { %3529 = vmatprep.subr.bf16.mxu0 %v4451_v34 }
  0x83   :  { %3486 = vmatpush3.bf16.msra.mxu1 %v4495_v3 }
  0x84   :  { %3487 = vmatprep.subr.bf16.mxu1 %v4294_v37 }
  0x85   :  { %3531 = vmatpush1.bf16.msra.mxu0 %v4456_v40 }
  0x86   :  { %3533 = vmatprep.subr.bf16.mxu0 %v4461_v41 }
  0x87   :  { %3489 = vmatpush3.bf16.msra.mxu1 %v4501_v7 }
  0x88   :  { %3490 = vmatprep.subr.bf16.mxu1 %v4294_v37 }
  0x89   :  { %3535 = vmatpush1.bf16.msra.mxu0 %v4466_v49 }
  0x8a   :  { %3537 = vmatprep.subr.bf16.mxu0 %v4469_v50 }
  0x8b   :  { %3492 = vmatpush3.bf16.msra.mxu1 %v4505_v12 }
  0x8c   :  { %3493 = vmatprep.subr.bf16.mxu1 %v4294_v37 }
  0x8d   :  { %3539 = vmatpush1.bf16.msra.mxu0 %v4474_v55 }
  0x8e   :  { %3541 = vmatprep.subr.bf16.mxu0 %v4478_v56 }
  0x8f   :  { %3495 = vmatpush3.bf16.msra.mxu1 %v4509_v17 }
  0x90   :  { %3496 = vmatprep.subr.bf16.mxu1 %v4294_v37 }
  0x91   :  { %3543 = vmatpush1.bf16.msra.mxu0 %v4484_v59 }
  0x92   :  { %3569 = vmatprep.subr.bf16.mxu0 %v4441_v26 }
  0x93   :  { %3498 = vmatpush3.bf16.msra.mxu1 %v4513_v21 }
  0x94   :  { %3499 = vmatprep.subr.bf16.mxu1 %v4294_v37 }
  0x97   :  { %3501 = vmatpush3.bf16.msra.mxu1 %v4517_v25 }
  0x98   :  { %3502 = vmatprep.subr.bf16.mxu1 %v4294_v37 }
  0x9b   :  { %3504 = vmatpush3.bf16.msra.mxu1 %v4521_v29 }
  0x9c   :  { %3544 = vmatprep.subr.bf16.mxu1 %v4294_v37 }
  0x9e   :  { %3102 = vmatmul.mubr.f32.vlgmr.msra.gmra.mrb[2].mxu1 %v4488_v62 }
  0x9f   :  { %3546 = vmatpush3.bf16.msra.mxu1 %v4490_v63  ;;  %3143 = vmatprep.mubr.msk.f32.mxu1 %vm4295_vm1, %v4293_v0 }
  0xa0   :  { %3547 = vmatprep.subr.bf16.mxu1 %v4294_v37 }
  0xa3   :  { %3549 = vmatpush3.bf16.msra.mxu1 %v4495_v3 }
  0xa4   :  { %3550 = vmatprep.subr.bf16.mxu1 %v4294_v37 }
  0xa7   :  { %3552 = vmatpush3.bf16.msra.mxu1 %v4501_v7 }
  0xa8   :  { %3553 = vmatprep.subr.bf16.mxu1 %v4294_v37 }
  0xab   :  { %3555 = vmatpush3.bf16.msra.mxu1 %v4505_v12 }
  0xac   :  { %3556 = vmatprep.subr.bf16.mxu1 %v4294_v37 }
  0xaf   :  { %3558 = vmatpush3.bf16.msra.mxu1 %v4509_v17 }
  0xb0   :  { %3559 = vmatprep.subr.bf16.mxu1 %v4294_v37 }
  0xb3   :  { %3561 = vmatpush3.bf16.msra.mxu1 %v4513_v21 }
  0xb4   :  { %3562 = vmatprep.subr.bf16.mxu1 %v4294_v37 }
  0xb7   :  { %3564 = vmatpush3.bf16.msra.mxu1 %v4517_v25 }
  0xb8   :  { %3565 = vmatprep.subr.bf16.mxu1 %v4294_v37 }
  0xbb   :  { %3567 = vmatpush3.bf16.msra.mxu1 %v4521_v29 }
  0xbc   :  { %3572 = vmatprep.subr.bf16.mxu1 %v4294_v37 }
 0x13b   :  { %v243_v35 = vpop.f32.mrb[0].mxu0 }
 0x13c   :  { %v245_v38 = vpop.f32.mrb[1].mxu0  ;;  %v244_v52 = vadd.f32 %v243_v35, %v4571_v44 }
 0x13d   :  { %v246_v54 = vadd.f32 %v245_v38, %v4576_v47 }
 0x13e   :  { %v3979_v58 = vadd.f32 %v4579_v53, %v244_v52 }
 0x13f   :  { %v314_v45 = vpop.f32.mrb[2].mxu0  ;;  %v3982_v60 = vadd.f32 %v4582_v57, %v246_v54  ;;  %v808_v54 = vld [vmem:[#allocation3 + $0x10] sm:$0xff] }
 0x140   :  { %v3068_v51 = vpop.f32.mrb[3].mxu0  ;;  %v315_v30 = vadd.f32 %v314_v45, %v4586_v19 }
 0x151   :  { %v400_v61 = vpop.f32.mrb[0].mxu1 }
 0x152   :  { %v3980_v1 = vadd.f32 %v3979_v58, %v400_v61  ;;  %v402_v2 = vpop.f32.mrb[1].mxu1  ;;  %v4643_v58 = vadd.f32 %v4579_v53, %v4571_v44 }
 0x153   :  { %v3983_v5 = vadd.f32 %v3982_v60, %v402_v2  ;;  %v4647_v60 = vadd.f32 %v4582_v57, %v4576_v47 }
 0x154   :  { %v2847_v6 = vmul.f32 -1.442695, %v3980_v1 }
 0x155   :  { %v2848_v10 = vmul.f32 -1.442695, %v3983_v5 }
 0x156   :  { %4040 = vpow2.f32 %v2847_v6 }
 0x157   :  { %4042 = vpow2.f32 %v2848_v10 }
 0x160   :  { %v4041_v11 = vpop.eup %4040 }
 0x161   :  { %v479_v13 = vadd.f32 1.0, %v4041_v11  ;;  %v4043_v18 = vpop.eup %4042 }
 0x162   :  { %v486_v23 = vadd.f32 1.0, %v4043_v18 }
 0x163   :  { %4044 = vrcp.f32 %v479_v13 }
 0x164   :  { %4046 = vrcp.f32 %v486_v23 }
 0x16d   :  { %v4045_v35 = vpop.eup %4044 }
 0x16e   :  { %v4047_v43 = vpop.eup %4046 }
 0x16f   :  { %v492_v51 = vsub.f32 1.0, %v4047_v43  ;;  %v494_v42 = vmul.f32 %v4047_v43, %v4488_v62  ;;  %v639_v62 = vpop.f32.mrb[6].mxu0 }
 0x170   :  { %v3110_v45 = vpop.f32.mrb[7].mxu0  ;;  %v640_v23 = vadd.f32 %v639_v62, %v4586_v19 }
 0x171   :  { %v471_v27 = vpop.f32.mrb[2].mxu1 }
 0x172   :  { %v472_v28 = vadd.f32 %v471_v27, %v4588_v22  ;;  %v3103_v33 = vpop.f32.mrb[3].mxu1 }
 0x174   :  { %v489_v38 = vmul.f32 %v4045_v35, %v472_v28 }
 0x176   :  { %v490_v39 = vadd.f32 %v489_v38, %v315_v30 }
 0x178   :  { %4048 = vtanh.f32 %v490_v39 }
 0x182   :  { %v4049_v36 = vpop.eup %4048 }
 0x183   :  { %v493_v52 = vmul.f32 %v4049_v36, %v492_v51 }
 0x185   :  { %v4593_v46 = vadd.f32 %v494_v42, %v493_v52  ;;  %v1118_v52 = vld [vmem:[#allocation3 + $0x18] sm:$0xff] }
 0x187   :  { %708 = vmatmul.mubr.f32.vlgmr.msra.gmra.mrb[4].mxu0 %v4593_v46  ;;  %3144 = vmatmul.mubr.f32.vlgmr.msra.gmra.mrb[4].mxu1 %v4593_v46 }
 0x188   :  { %3571 = vmatpush1.bf16.msra.mxu0 %v4443_v31  ;;  %3574 = vmatpush3.bf16.msra.mxu1 %v4463_v48 }
 0x189   :  { %876 = vmatprep.mubr.f32.mxu0 %v4293_v0  ;;  %3150 = vmatprep.mubr.msk.f32.mxu1 %vm4295_vm1, %v4293_v0 }
 0x18a   :  { %3576 = vmatprep.subr.bf16.mxu0 %v4422_v4  ;;  %3607 = vmatprep.subr.bf16.mxu1 %v4294_v37 }
 0x18b   :  { %2853 = vmatmul.mubr.msk.f32.vlgmr.msra.gmra.mrb[8].mxu0 %vm173_vm0, %v808_v54  ;;  %3151 = vmatmul.mubr.msk.f32.vlgmr.msra.gmra.mrb[6].mxu1 %vm173_vm0, %v808_v54 }
 0x18c   :  { %3578 = vmatpush1.bf16.msra.mxu0 %v4424_v8  ;;  %3609 = vmatpush3.bf16.msra.mxu1 %v4490_v63 }
 0x18d   :  { %3580 = vmatprep.subr.bf16.mxu0 %v4426_v9  ;;  %3610 = vmatprep.subr.bf16.mxu1 %v4294_v37 }
 0x18e   :  { %1017 = vmatprep.mubr.f32.mxu0 %v4293_v0  ;;  %3185 = vmatprep.mubr.msk.f32.mxu1 %vm4295_vm1, %v4293_v0 }
 0x190   :  { %3582 = vmatpush1.bf16.msra.mxu0 %v4430_v14  ;;  %3612 = vmatpush3.bf16.msra.mxu1 %v4495_v3 }
 0x191   :  { %3584 = vmatprep.subr.bf16.mxu0 %v4433_v15  ;;  %3613 = vmatprep.subr.bf16.mxu1 %v4294_v37 }
 0x194   :  { %3586 = vmatpush1.bf16.msra.mxu0 %v4436_v20  ;;  %3615 = vmatpush3.bf16.msra.mxu1 %v4501_v7 }
 0x195   :  { %3588 = vmatprep.subr.bf16.mxu0 %v4439_v24  ;;  %3616 = vmatprep.subr.bf16.mxu1 %v4294_v37 }
 0x198   :  { %3590 = vmatpush1.bf16.msra.mxu0 %v4447_v32  ;;  %3618 = vmatpush3.bf16.msra.mxu1 %v4505_v12 }
 0x199   :  { %3592 = vmatprep.subr.bf16.mxu0 %v4451_v34  ;;  %3619 = vmatprep.subr.bf16.mxu1 %v4294_v37 }
 0x19c   :  { %3594 = vmatpush1.bf16.msra.mxu0 %v4456_v40  ;;  %3621 = vmatpush3.bf16.msra.mxu1 %v4509_v17 }
 0x19d   :  { %3596 = vmatprep.subr.bf16.mxu0 %v4461_v41  ;;  %3622 = vmatprep.subr.bf16.mxu1 %v4294_v37 }
 0x1a0   :  { %3598 = vmatpush1.bf16.msra.mxu0 %v4466_v49  ;;  %3624 = vmatpush3.bf16.msra.mxu1 %v4513_v21 }
 0x1a1   :  { %3600 = vmatprep.subr.bf16.mxu0 %v4469_v50  ;;  %3625 = vmatprep.subr.bf16.mxu1 %v4294_v37 }
 0x1a4   :  { %3602 = vmatpush1.bf16.msra.mxu0 %v4474_v55  ;;  %3627 = vmatpush3.bf16.msra.mxu1 %v4517_v25 }
 0x1a5   :  { %3604 = vmatprep.subr.bf16.mxu0 %v4478_v56  ;;  %3628 = vmatprep.subr.bf16.mxu1 %v4294_v37 }
 0x1a8   :  { %3606 = vmatpush1.bf16.msra.mxu0 %v4484_v59  ;;  %3630 = vmatpush3.bf16.msra.mxu1 %v4521_v29 }
 0x1a9   :  { %3632 = vmatprep.subr.bf16.mxu0 %v4441_v26  ;;  %3635 = vmatprep.subr.bf16.mxu1 %v4294_v37 }
 0x25a   :  { %v709_v61 = vpop.f32.mrb[4].mxu0  ;;  %v780_v1 = vpop.f32.mrb[4].mxu1 }
 0x25b   :  { %v3985_v2 = vadd.f32 %v4643_v58, %v709_v61  ;;  %v711_v5 = vpop.f32.mrb[5].mxu0  ;;  %v3145_v6 = vpop.f32.mrb[5].mxu1  ;;  %v781_v47 = vadd.f32 %v780_v1, %v4588_v22 }
 0x25c   :  { %v3987_v11 = vadd.f32 %v4647_v60, %v711_v5 }
 0x25d   :  { %v2851_v10 = vmul.f32 -1.442695, %v3985_v2 }
 0x25e   :  { %v2852_v13 = vmul.f32 -1.442695, %v3987_v11  ;;  %v949_v51 = vpop.f32.mrb[6].mxu1 }
 0x25f   :  { %4050 = vpow2.f32 %v2851_v10  ;;  %v3152_v36 = vpop.f32.mrb[7].mxu1 }
 0x260   :  { %4052 = vpow2.f32 %v2852_v13 }
 0x269   :  { %v4051_v16 = vpop.eup %4050 }
 0x26a   :  { %v788_v18 = vadd.f32 1.0, %v4051_v16  ;;  %v4053_v44 = vpop.eup %4052 }
 0x26b   :  { %v795_v53 = vadd.f32 1.0, %v4053_v44  ;;  %v950_v44 = vadd.f32 %v949_v51, %v4586_v19 }
 0x26c   :  { %4054 = vrcp.f32 %v788_v18 }
 0x26d   :  { %4056 = vrcp.f32 %v795_v53 }
 0x276   :  { %v4055_v57 = vpop.eup %4054 }
 0x277   :  { %v798_v27 = vmul.f32 %v4055_v57, %v781_v47  ;;  %v4057_v30 = vpop.eup %4056 }
 0x278   :  { %v801_v33 = vsub.f32 1.0, %v4057_v30  ;;  %v803_v39 = vmul.f32 %v4057_v30, %v4593_v46 }
 0x279   :  { %v799_v28 = vadd.f32 %v798_v27, %v640_v23 }
 0x27b   :  { %4058 = vtanh.f32 %v799_v28 }
 0x285   :  { %v4059_v35 = vpop.eup %4058 }
 0x286   :  { %v802_v38 = vmul.f32 %v4059_v35, %v801_v33 }
 0x288   :  { %v4654_v43 = vadd.f32 %v803_v39, %v802_v38  ;;  %v1428_v39 = vld [vmem:[#allocation3 + $0x20] sm:$0xff] }
 0x28a   :  { %1018 = vmatmul.mubr.f32.vlgmr.msra.gmra.mrb[8].mxu0 %v4654_v43  ;;  %3186 = vmatmul.mubr.f32.vlgmr.msra.gmra.mrb[8].mxu1 %v4654_v43 }
 0x28b   :  { %3634 = vmatpush1.bf16.msra.mxu0 %v4443_v31  ;;  %3637 = vmatpush3.bf16.msra.mxu1 %v4463_v48 }
 0x28c   :  { %1186 = vmatprep.mubr.f32.mxu0 %v4293_v0  ;;  %3192 = vmatprep.mubr.msk.f32.mxu1 %vm4295_vm1, %v4293_v0 }
 0x28d   :  { %3639 = vmatprep.subr.bf16.mxu0 %v4422_v4  ;;  %3670 = vmatprep.subr.bf16.mxu1 %v4294_v37 }
 0x28e   :  { %2857 = vmatmul.mubr.msk.f32.vlgmr.msra.gmra.mrb[10].mxu0 %vm173_vm0, %v1118_v52  ;;  %3193 = vmatmul.mubr.msk.f32.vlgmr.msra.gmra.mrb[10].mxu1 %vm173_vm0, %v1118_v52 }
 0x28f   :  { %3641 = vmatpush1.bf16.msra.mxu0 %v4424_v8  ;;  %3672 = vmatpush3.bf16.msra.mxu1 %v4490_v63 }
 0x290   :  { %3643 = vmatprep.subr.bf16.mxu0 %v4426_v9  ;;  %3673 = vmatprep.subr.bf16.mxu1 %v4294_v37 }
 0x291   :  { %1327 = vmatprep.mubr.f32.mxu0 %v4293_v0  ;;  %3227 = vmatprep.mubr.msk.f32.mxu1 %vm4295_vm1, %v4293_v0 }
 0x293   :  { %3645 = vmatpush1.bf16.msra.mxu0 %v4430_v14  ;;  %3675 = vmatpush3.bf16.msra.mxu1 %v4495_v3 }
 0x294   :  { %3647 = vmatprep.subr.bf16.mxu0 %v4433_v15  ;;  %3676 = vmatprep.subr.bf16.mxu1 %v4294_v37 }
 0x297   :  { %3649 = vmatpush1.bf16.msra.mxu0 %v4436_v20  ;;  %3678 = vmatpush3.bf16.msra.mxu1 %v4501_v7 }
 0x298   :  { %3651 = vmatprep.subr.bf16.mxu0 %v4439_v24  ;;  %3679 = vmatprep.subr.bf16.mxu1 %v4294_v37 }
 0x29b   :  { %3653 = vmatpush1.bf16.msra.mxu0 %v4447_v32  ;;  %3681 = vmatpush3.bf16.msra.mxu1 %v4505_v12 }
 0x29c   :  { %3655 = vmatprep.subr.bf16.mxu0 %v4451_v34  ;;  %3682 = vmatprep.subr.bf16.mxu1 %v4294_v37 }
 0x29f   :  { %3657 = vmatpush1.bf16.msra.mxu0 %v4456_v40  ;;  %3684 = vmatpush3.bf16.msra.mxu1 %v4509_v17 }
 0x2a0   :  { %3659 = vmatprep.subr.bf16.mxu0 %v4461_v41  ;;  %3685 = vmatprep.subr.bf16.mxu1 %v4294_v37 }
 0x2a3   :  { %3661 = vmatpush1.bf16.msra.mxu0 %v4466_v49  ;;  %3687 = vmatpush3.bf16.msra.mxu1 %v4513_v21 }
 0x2a4   :  { %3663 = vmatprep.subr.bf16.mxu0 %v4469_v50  ;;  %3688 = vmatprep.subr.bf16.mxu1 %v4294_v37 }
 0x2a7   :  { %3665 = vmatpush1.bf16.msra.mxu0 %v4474_v55  ;;  %3690 = vmatpush3.bf16.msra.mxu1 %v4517_v25 }
 0x2a8   :  { %3667 = vmatprep.subr.bf16.mxu0 %v4478_v56  ;;  %3691 = vmatprep.subr.bf16.mxu1 %v4294_v37 }
 0x2ab   :  { %3669 = vmatpush1.bf16.msra.mxu0 %v4484_v59  ;;  %3693 = vmatpush3.bf16.msra.mxu1 %v4521_v29 }
 0x2ac   :  { %3695 = vmatprep.subr.bf16.mxu0 %v4441_v26  ;;  %3698 = vmatprep.subr.bf16.mxu1 %v4294_v37 }
 0x35d   :  { %v1019_v42 = vpop.f32.mrb[8].mxu0  ;;  %v1090_v62 = vpop.f32.mrb[8].mxu1 }
 0x35e   :  { %v3989_v45 = vadd.f32 %v4643_v58, %v1019_v42  ;;  %v1021_v54 = vpop.f32.mrb[9].mxu0  ;;  %v3187_v61 = vpop.f32.mrb[9].mxu1  ;;  %v1091_v16 = vadd.f32 %v1090_v62, %v4588_v22 }
 0x35f   :  { %v3991_v2 = vadd.f32 %v4647_v60, %v1021_v54 }
 0x360   :  { %v2855_v1 = vmul.f32 -1.442695, %v3989_v45 }
 0x361   :  { %v2856_v5 = vmul.f32 -1.442695, %v3991_v2  ;;  %v1259_v35 = vpop.f32.mrb[10].mxu1 }
 0x362   :  { %4060 = vpow2.f32 %v2855_v1  ;;  %v3194_v38 = vpop.f32.mrb[11].mxu1 }
 0x363   :  { %4062 = vpow2.f32 %v2856_v5 }
 0x36c   :  { %v4061_v6 = vpop.eup %4060 }
 0x36d   :  { %v1098_v10 = vadd.f32 1.0, %v4061_v6  ;;  %v4063_v11 = vpop.eup %4062 }
 0x36e   :  { %v1105_v13 = vadd.f32 1.0, %v4063_v11 }
 0x36f   :  { %4064 = vrcp.f32 %v1098_v10 }
 0x370   :  { %4066 = vrcp.f32 %v1105_v13  ;;  %v1260_v13 = vadd.f32 %v1259_v35, %v4586_v19  ;;  %v1738_v35 = vld [vmem:[#allocation3 + $0x28] sm:$0xff] }
 0x379   :  { %v4065_v18 = vpop.eup %4064 }
 0x37a   :  { %v1108_v53 = vmul.f32 %v4065_v18, %v1091_v16  ;;  %v4067_v57 = vpop.eup %4066 }
 0x37b   :  { %v1111_v23 = vsub.f32 1.0, %v4067_v57  ;;  %v1113_v30 = vmul.f32 %v4067_v57, %v4654_v43 }
 0x37c   :  { %v1109_v47 = vadd.f32 %v1108_v53, %v950_v44 }
 0x37e   :  { %4068 = vtanh.f32 %v1109_v47 }
 0x388   :  { %v4069_v27 = vpop.eup %4068 }
 0x389   :  { %v1112_v28 = vmul.f32 %v4069_v27, %v1111_v23 }
 0x38b   :  { %v4707_v33 = vadd.f32 %v1113_v30, %v1112_v28 }
 0x38d   :  { %1328 = vmatmul.mubr.f32.vlgmr.msra.gmra.mrb[10].mxu0 %v4707_v33  ;;  %3228 = vmatmul.mubr.f32.vlgmr.msra.gmra.mrb[12].mxu1 %v4707_v33 }
 0x38e   :  { %3697 = vmatpush1.bf16.msra.mxu0 %v4443_v31  ;;  %3700 = vmatpush3.bf16.msra.mxu1 %v4463_v48 }
 0x38f   :  { %1496 = vmatprep.mubr.f32.mxu0 %v4293_v0  ;;  %3234 = vmatprep.mubr.msk.f32.mxu1 %vm4295_vm1, %v4293_v0 }
 0x390   :  { %3702 = vmatprep.subr.bf16.mxu0 %v4422_v4  ;;  %3733 = vmatprep.subr.bf16.mxu1 %v4294_v37 }
 0x391   :  { %2861 = vmatmul.mubr.msk.f32.vlgmr.msra.gmra.mrb[12].mxu0 %vm173_vm0, %v1428_v39  ;;  %3235 = vmatmul.mubr.msk.f32.vlgmr.msra.gmra.mrb[14].mxu1 %vm173_vm0, %v1428_v39 }
 0x392   :  { %3704 = vmatpush1.bf16.msra.mxu0 %v4424_v8  ;;  %3735 = vmatpush3.bf16.msra.mxu1 %v4490_v63 }
 0x393   :  { %3706 = vmatprep.subr.bf16.mxu0 %v4426_v9  ;;  %3736 = vmatprep.subr.bf16.mxu1 %v4294_v37 }
 0x394   :  { %1637 = vmatprep.mubr.f32.mxu0 %v4293_v0  ;;  %3269 = vmatprep.mubr.msk.f32.mxu1 %vm4295_vm1, %v4293_v0 }
 0x396   :  { %3708 = vmatpush1.bf16.msra.mxu0 %v4430_v14  ;;  %3738 = vmatpush3.bf16.msra.mxu1 %v4495_v3 }
 0x397   :  { %3710 = vmatprep.subr.bf16.mxu0 %v4433_v15  ;;  %3739 = vmatprep.subr.bf16.mxu1 %v4294_v37 }
 0x39a   :  { %3712 = vmatpush1.bf16.msra.mxu0 %v4436_v20  ;;  %3741 = vmatpush3.bf16.msra.mxu1 %v4501_v7 }
 0x39b   :  { %3714 = vmatprep.subr.bf16.mxu0 %v4439_v24  ;;  %3742 = vmatprep.subr.bf16.mxu1 %v4294_v37 }
 0x39e   :  { %3716 = vmatpush1.bf16.msra.mxu0 %v4447_v32  ;;  %3744 = vmatpush3.bf16.msra.mxu1 %v4505_v12 }
 0x39f   :  { %3718 = vmatprep.subr.bf16.mxu0 %v4451_v34  ;;  %3745 = vmatprep.subr.bf16.mxu1 %v4294_v37 }
 0x3a2   :  { %3720 = vmatpush1.bf16.msra.mxu0 %v4456_v40  ;;  %3747 = vmatpush3.bf16.msra.mxu1 %v4509_v17 }
 0x3a3   :  { %3722 = vmatprep.subr.bf16.mxu0 %v4461_v41  ;;  %3748 = vmatprep.subr.bf16.mxu1 %v4294_v37 }
 0x3a6   :  { %3724 = vmatpush1.bf16.msra.mxu0 %v4466_v49  ;;  %3750 = vmatpush3.bf16.msra.mxu1 %v4513_v21 }
 0x3a7   :  { %3726 = vmatprep.subr.bf16.mxu0 %v4469_v50  ;;  %3751 = vmatprep.subr.bf16.mxu1 %v4294_v37 }
 0x3aa   :  { %3728 = vmatpush1.bf16.msra.mxu0 %v4474_v55  ;;  %3753 = vmatpush3.bf16.msra.mxu1 %v4517_v25 }
 0x3ab   :  { %3730 = vmatprep.subr.bf16.mxu0 %v4478_v56  ;;  %3754 = vmatprep.subr.bf16.mxu1 %v4294_v37 }
 0x3ae   :  { %3732 = vmatpush1.bf16.msra.mxu0 %v4484_v59  ;;  %3756 = vmatpush3.bf16.msra.mxu1 %v4521_v29 }
 0x3af   :  { %3758 = vmatprep.subr.bf16.mxu0 %v4441_v26  ;;  %3761 = vmatprep.subr.bf16.mxu1 %v4294_v37 }
 0x460   :  { %v1329_v51 = vpop.f32.mrb[10].mxu0  ;;  %v1400_v36 = vpop.f32.mrb[12].mxu1 }
 0x461   :  { %v3993_v52 = vadd.f32 %v4643_v58, %v1329_v51  ;;  %v1331_v42 = vpop.f32.mrb[11].mxu0  ;;  %v3229_v62 = vpop.f32.mrb[13].mxu1  ;;  %v1401_v10 = vadd.f32 %v1400_v36, %v4588_v22 }
 0x462   :  { %v3995_v54 = vadd.f32 %v4647_v60, %v1331_v42 }
 0x463   :  { %v2859_v45 = vmul.f32 -1.442695, %v3993_v52 }
 0x464   :  { %v2860_v61 = vmul.f32 -1.442695, %v3995_v54  ;;  %v1569_v28 = vpop.f32.mrb[14].mxu1 }
 0x465   :  { %4070 = vpow2.f32 %v2859_v45  ;;  %v3236_v30 = vpop.f32.mrb[15].mxu1 }
 0x466   :  { %4072 = vpow2.f32 %v2860_v61  ;;  %v2048_v30 = vld [vmem:[#allocation3 + $0x30] sm:$0xff] }
 0x46f   :  { %v4071_v1 = vpop.eup %4070 }
 0x470   :  { %v1408_v2 = vadd.f32 1.0, %v4071_v1  ;;  %v4073_v5 = vpop.eup %4072 }
 0x471   :  { %v1415_v6 = vadd.f32 1.0, %v4073_v5 }
 0x472   :  { %4074 = vrcp.f32 %v1408_v2 }
 0x473   :  { %4076 = vrcp.f32 %v1415_v6 }
 0x47c   :  { %v4075_v11 = vpop.eup %4074 }
 0x47d   :  { %v1418_v16 = vmul.f32 %v4075_v11, %v1401_v10  ;;  %v4077_v44 = vpop.eup %4076  ;;  %v1570_v10 = vadd.f32 %v1569_v28, %v4586_v19 }
 0x47e   :  { %v1421_v53 = vsub.f32 1.0, %v4077_v44  ;;  %v1423_v23 = vmul.f32 %v4077_v44, %v4707_v33 }
 0x47f   :  { %v1419_v18 = vadd.f32 %v1418_v16, %v1260_v13 }
 0x481   :  { %4078 = vtanh.f32 %v1419_v18 }
 0x48b   :  { %v4079_v47 = vpop.eup %4078 }
 0x48c   :  { %v1422_v57 = vmul.f32 %v4079_v47, %v1421_v53 }
 0x48e   :  { %v4760_v27 = vadd.f32 %v1423_v23, %v1422_v57 }
 0x490   :  { %1638 = vmatmul.mubr.f32.vlgmr.msra.gmra.mrb[12].mxu0 %v4760_v27  ;;  %3270 = vmatmul.mubr.f32.vlgmr.msra.gmra.mrb[16].mxu1 %v4760_v27 }
 0x491   :  { %3760 = vmatpush1.bf16.msra.mxu0 %v4443_v31  ;;  %3763 = vmatpush3.bf16.msra.mxu1 %v4463_v48 }
 0x492   :  { %1806 = vmatprep.mubr.f32.mxu0 %v4293_v0  ;;  %3276 = vmatprep.mubr.msk.f32.mxu1 %vm4295_vm1, %v4293_v0 }
 0x493   :  { %3765 = vmatprep.subr.bf16.mxu0 %v4422_v4  ;;  %3796 = vmatprep.subr.bf16.mxu1 %v4294_v37 }
 0x494   :  { %2865 = vmatmul.mubr.msk.f32.vlgmr.msra.gmra.mrb[14].mxu0 %vm173_vm0, %v1738_v35  ;;  %3277 = vmatmul.mubr.msk.f32.vlgmr.msra.gmra.mrb[18].mxu1 %vm173_vm0, %v1738_v35 }
 0x495   :  { %3767 = vmatpush1.bf16.msra.mxu0 %v4424_v8  ;;  %3798 = vmatpush3.bf16.msra.mxu1 %v4490_v63 }
 0x496   :  { %3769 = vmatprep.subr.bf16.mxu0 %v4426_v9  ;;  %3799 = vmatprep.subr.bf16.mxu1 %v4294_v37 }
 0x497   :  { %1947 = vmatprep.mubr.f32.mxu0 %v4293_v0  ;;  %3311 = vmatprep.mubr.msk.f32.mxu1 %vm4295_vm1, %v4293_v0 }
 0x499   :  { %3771 = vmatpush1.bf16.msra.mxu0 %v4430_v14  ;;  %3801 = vmatpush3.bf16.msra.mxu1 %v4495_v3 }
 0x49a   :  { %3773 = vmatprep.subr.bf16.mxu0 %v4433_v15  ;;  %3802 = vmatprep.subr.bf16.mxu1 %v4294_v37 }
 0x49d   :  { %3775 = vmatpush1.bf16.msra.mxu0 %v4436_v20  ;;  %3804 = vmatpush3.bf16.msra.mxu1 %v4501_v7 }
 0x49e   :  { %3777 = vmatprep.subr.bf16.mxu0 %v4439_v24  ;;  %3805 = vmatprep.subr.bf16.mxu1 %v4294_v37 }
 0x4a1   :  { %3779 = vmatpush1.bf16.msra.mxu0 %v4447_v32  ;;  %3807 = vmatpush3.bf16.msra.mxu1 %v4505_v12 }
 0x4a2   :  { %3781 = vmatprep.subr.bf16.mxu0 %v4451_v34  ;;  %3808 = vmatprep.subr.bf16.mxu1 %v4294_v37 }
 0x4a5   :  { %3783 = vmatpush1.bf16.msra.mxu0 %v4456_v40  ;;  %3810 = vmatpush3.bf16.msra.mxu1 %v4509_v17 }
 0x4a6   :  { %3785 = vmatprep.subr.bf16.mxu0 %v4461_v41  ;;  %3811 = vmatprep.subr.bf16.mxu1 %v4294_v37 }
 0x4a9   :  { %3787 = vmatpush1.bf16.msra.mxu0 %v4466_v49  ;;  %3813 = vmatpush3.bf16.msra.mxu1 %v4513_v21 }
 0x4aa   :  { %3789 = vmatprep.subr.bf16.mxu0 %v4469_v50  ;;  %3814 = vmatprep.subr.bf16.mxu1 %v4294_v37 }
 0x4ad   :  { %3791 = vmatpush1.bf16.msra.mxu0 %v4474_v55  ;;  %3816 = vmatpush3.bf16.msra.mxu1 %v4517_v25 }
 0x4ae   :  { %3793 = vmatprep.subr.bf16.mxu0 %v4478_v56  ;;  %3817 = vmatprep.subr.bf16.mxu1 %v4294_v37 }
 0x4b1   :  { %3795 = vmatpush1.bf16.msra.mxu0 %v4484_v59  ;;  %3819 = vmatpush3.bf16.msra.mxu1 %v4521_v29 }
 0x4b2   :  { %3821 = vmatprep.subr.bf16.mxu0 %v4441_v26  ;;  %3824 = vmatprep.subr.bf16.mxu1 %v4294_v37 }
 0x563   :  { %v1639_v38 = vpop.f32.mrb[12].mxu0  ;;  %v1710_v39 = vpop.f32.mrb[16].mxu1 }
 0x564   :  { %v3997_v51 = vadd.f32 %v4643_v58, %v1639_v38  ;;  %v1641_v36 = vpop.f32.mrb[13].mxu0  ;;  %v3271_v52 = vpop.f32.mrb[17].mxu1  ;;  %v1711_v5 = vadd.f32 %v1710_v39, %v4588_v22 }
 0x565   :  { %v3999_v62 = vadd.f32 %v4647_v60, %v1641_v36 }
 0x566   :  { %v2863_v42 = vmul.f32 -1.442695, %v3997_v51 }
 0x567   :  { %v2864_v45 = vmul.f32 -1.442695, %v3999_v62  ;;  %v1879_v23 = vpop.f32.mrb[18].mxu1 }
 0x568   :  { %4080 = vpow2.f32 %v2863_v42  ;;  %v3278_v28 = vpop.f32.mrb[19].mxu1 }
 0x569   :  { %4082 = vpow2.f32 %v2864_v45  ;;  %v2358_v28 = vld [vmem:[#allocation3 + $0x38] sm:$0xff] }
 0x572   :  { %v4081_v54 = vpop.eup %4080 }
 0x573   :  { %v1718_v61 = vadd.f32 1.0, %v4081_v54  ;;  %v4083_v1 = vpop.eup %4082 }
 0x574   :  { %v1725_v2 = vadd.f32 1.0, %v4083_v1 }
 0x575   :  { %4084 = vrcp.f32 %v1718_v61 }
 0x576   :  { %4086 = vrcp.f32 %v1725_v2 }
 0x57f   :  { %v4085_v6 = vpop.eup %4084 }
 0x580   :  { %v1728_v11 = vmul.f32 %v4085_v6, %v1711_v5  ;;  %v4087_v16 = vpop.eup %4086  ;;  %v1880_v5 = vadd.f32 %v1879_v23, %v4586_v19 }
 0x581   :  { %v1731_v18 = vsub.f32 1.0, %v4087_v16  ;;  %v1733_v47 = vmul.f32 %v4087_v16, %v4760_v27 }
 0x582   :  { %v1729_v13 = vadd.f32 %v1728_v11, %v1570_v10 }
 0x584   :  { %4088 = vtanh.f32 %v1729_v13 }
 0x58e   :  { %v4089_v44 = vpop.eup %4088 }
 0x58f   :  { %v1732_v53 = vmul.f32 %v4089_v44, %v1731_v18 }
 0x591   :  { %v4813_v57 = vadd.f32 %v1733_v47, %v1732_v53 }
 0x593   :  { %1948 = vmatmul.mubr.f32.vlgmr.msra.gmra.mrb[14].mxu0 %v4813_v57  ;;  %3312 = vmatmul.mubr.f32.vlgmr.msra.gmra.mrb[20].mxu1 %v4813_v57 }
 0x594   :  { %3823 = vmatpush1.bf16.msra.mxu0 %v4443_v31  ;;  %3826 = vmatpush3.bf16.msra.mxu1 %v4463_v48 }
 0x595   :  { %2116 = vmatprep.mubr.f32.mxu0 %v4293_v0  ;;  %3318 = vmatprep.mubr.msk.f32.mxu1 %vm4295_vm1, %v4293_v0 }
 0x596   :  { %3828 = vmatprep.subr.bf16.mxu0 %v4422_v4  ;;  %3859 = vmatprep.subr.bf16.mxu1 %v4294_v37 }
 0x597   :  { %2869 = vmatmul.mubr.msk.f32.vlgmr.msra.gmra.mrb[16].mxu0 %vm173_vm0, %v2048_v30  ;;  %3319 = vmatmul.mubr.msk.f32.vlgmr.msra.gmra.mrb[22].mxu1 %vm173_vm0, %v2048_v30 }
 0x598   :  { %3830 = vmatpush1.bf16.msra.mxu0 %v4424_v8  ;;  %3861 = vmatpush3.bf16.msra.mxu1 %v4490_v63 }
 0x599   :  { %3832 = vmatprep.subr.bf16.mxu0 %v4426_v9  ;;  %3862 = vmatprep.subr.bf16.mxu1 %v4294_v37 }
 0x59a   :  { %2257 = vmatprep.mubr.f32.mxu0 %v4293_v0  ;;  %3353 = vmatprep.mubr.msk.f32.mxu1 %vm4295_vm1, %v4293_v0 }
 0x59c   :  { %3834 = vmatpush1.bf16.msra.mxu0 %v4430_v14  ;;  %3864 = vmatpush3.bf16.msra.mxu1 %v4495_v3 }
 0x59d   :  { %3836 = vmatprep.subr.bf16.mxu0 %v4433_v15  ;;  %3865 = vmatprep.subr.bf16.mxu1 %v4294_v37 }
 0x5a0   :  { %3838 = vmatpush1.bf16.msra.mxu0 %v4436_v20  ;;  %3867 = vmatpush3.bf16.msra.mxu1 %v4501_v7 }
 0x5a1   :  { %3840 = vmatprep.subr.bf16.mxu0 %v4439_v24  ;;  %3868 = vmatprep.subr.bf16.mxu1 %v4294_v37 }
 0x5a4   :  { %3842 = vmatpush1.bf16.msra.mxu0 %v4447_v32  ;;  %3870 = vmatpush3.bf16.msra.mxu1 %v4505_v12 }
 0x5a5   :  { %3844 = vmatprep.subr.bf16.mxu0 %v4451_v34  ;;  %3871 = vmatprep.subr.bf16.mxu1 %v4294_v37 }
 0x5a8   :  { %3846 = vmatpush1.bf16.msra.mxu0 %v4456_v40  ;;  %3873 = vmatpush3.bf16.msra.mxu1 %v4509_v17 }
 0x5a9   :  { %3848 = vmatprep.subr.bf16.mxu0 %v4461_v41  ;;  %3874 = vmatprep.subr.bf16.mxu1 %v4294_v37 }
 0x5ac   :  { %3850 = vmatpush1.bf16.msra.mxu0 %v4466_v49  ;;  %3876 = vmatpush3.bf16.msra.mxu1 %v4513_v21 }
 0x5ad   :  { %3852 = vmatprep.subr.bf16.mxu0 %v4469_v50  ;;  %3877 = vmatprep.subr.bf16.mxu1 %v4294_v37 }
 0x5b0   :  { %3854 = vmatpush1.bf16.msra.mxu0 %v4474_v55  ;;  %3879 = vmatpush3.bf16.msra.mxu1 %v4517_v25 }
 0x5b1   :  { %3856 = vmatprep.subr.bf16.mxu0 %v4478_v56  ;;  %3880 = vmatprep.subr.bf16.mxu1 %v4294_v37 }
 0x5b4   :  { %3858 = vmatpush1.bf16.msra.mxu0 %v4484_v59  ;;  %3882 = vmatpush3.bf16.msra.mxu1 %v4521_v29 }
 0x5b5   :  { %3884 = vmatprep.subr.bf16.mxu0 %v4441_v26  ;;  %3887 = vmatprep.subr.bf16.mxu1 %v4294_v37 }
 0x666   :  { %v1949_v35 = vpop.f32.mrb[14].mxu0  ;;  %v2020_v38 = vpop.f32.mrb[20].mxu1 }
 0x667   :  { %v4001_v39 = vadd.f32 %v4643_v58, %v1949_v35  ;;  %v1951_v51 = vpop.f32.mrb[15].mxu0  ;;  %v3313_v36 = vpop.f32.mrb[21].mxu1  ;;  %v2021_v26 = vadd.f32 %v2020_v38, %v4588_v22  ;;  %v2680_v35 = vld [vmem:[#allocation11 + $0x20] sm:$0xff]  ;;  %v2681_v38 = vld [vmem:[#allocation11 + $0x28] sm:$0xff] }
 0x668   :  { %v4003_v42 = vadd.f32 %v4647_v60, %v1951_v51  ;;  %v2682_v51 = vld [vmem:[#allocation11 + $0x30] sm:$0xff]  ;;  %v2683_v36 = vld [vmem:[#allocation11 + $0x38] sm:$0xff] }
 0x669   :  { %v2867_v52 = vmul.f32 -1.442695, %v4001_v39  ;;  %v3954_v39 = vpack.c.bf16 %v2681_v38, %v2680_v35 }
 0x66a   :  { %v2868_v62 = vmul.f32 -1.442695, %v4003_v42  ;;  %v2189_v47 = vpop.f32.mrb[22].mxu1  ;;  %v2684_v42 = vld [vmem:[#allocation11 + $0x40] sm:$0xff] }
 0x66b   :  { %4090 = vpow2.f32 %v2867_v52  ;;  %v3320_v23 = vpop.f32.mrb[23].mxu1  ;;  %v3958_v52 = vpack.c.bf16 %v2683_v36, %v2682_v51 }
 0x66c   :  { %4092 = vpow2.f32 %v2868_v62  ;;  %v2685_v62 = vld [vmem:[#allocation11 + $0x48] sm:$0xff] }
 0x675   :  { %v4091_v45 = vpop.eup %4090 }
 0x676   :  { %v2028_v54 = vadd.f32 1.0, %v4091_v45  ;;  %v4093_v61 = vpop.eup %4092  ;;  %v3962_v45 = vpack.c.bf16 %v2685_v62, %v2684_v42 }
 0x677   :  { %v2035_v1 = vadd.f32 1.0, %v4093_v61  ;;  %v2687_v61 = vld [vmem:[#allocation11 + $0x58] sm:$0xff] }
 0x678   :  { %4094 = vrcp.f32 %v2028_v54  ;;  %v2686_v54 = vld [vmem:[#allocation11 + $0x50] sm:$0xff] }
 0x679   :  { %4096 = vrcp.f32 %v2035_v1  ;;  %v3966_v1 = vpack.c.bf16 %v2687_v61, %v2686_v54 }
 0x682   :  { %v4095_v2 = vpop.eup %4094 }
 0x683   :  { %v2038_v6 = vmul.f32 %v4095_v2, %v2021_v26  ;;  %v4097_v11 = vpop.eup %4096  ;;  %v2688_v26 = vld [vmem:[#allocation11 + $0x60] sm:$0xff]  ;;  %v2689_v2 = vld [vmem:[#allocation11 + $0x68] sm:$0xff] }
 0x684   :  { %v2041_v13 = vsub.f32 1.0, %v4097_v11  ;;  %v2043_v44 = vmul.f32 %v4097_v11, %v4813_v57 }
 0x685   :  { %v2039_v10 = vadd.f32 %v2038_v6, %v1880_v5  ;;  %v2690_v5 = vld [vmem:[#allocation11 + $0x70] sm:$0xff]  ;;  %v2691_v6 = vld [vmem:[#allocation11 + $0x78] sm:$0xff] }
 0x687   :  { %4098 = vtanh.f32 %v2039_v10  ;;  %v3974_v10 = vpack.c.bf16 %v2691_v6, %v2690_v5 }
 0x691   :  { %v4099_v16 = vpop.eup %4098 }
 0x692   :  { %v2042_v18 = vmul.f32 %v4099_v16, %v2041_v13 }
 0x694   :  { %v4866_v53 = vadd.f32 %v2043_v44, %v2042_v18 }
 0x696   :  { %2258 = vmatmul.mubr.f32.vlgmr.msra.gmra.mrb[16].mxu0 %v4866_v53  ;;  %3354 = vmatmul.mubr.f32.vlgmr.msra.gmra.mrb[24].mxu1 %v4866_v53 }
 0x697   :  { %3886 = vmatpush1.bf16.msra.mxu0 %v4443_v31  ;;  %3889 = vmatpush3.bf16.msra.mxu1 %v4463_v48 }
 0x698   :  { %2426 = vmatprep.mubr.f32.mxu0 %v4293_v0  ;;  %3891 = vmatprep.subr.bf16.mxu0 %v4422_v4  ;;  %v2677_v4 = vld [vmem:[#allocation11 + $0x8] sm:$0xff] }
 0x699   :  { %3360 = vmatprep.mubr.msk.f32.mxu1 %vm4295_vm1, %v4293_v0  ;;  %3922 = vmatprep.subr.bf16.mxu1 %v4294_v37 }
 0x69a   :  { %2873 = vmatmul.mubr.msk.f32.vlgmr.msra.gmra.mrb[18].mxu0 %vm173_vm0, %v2358_v28  ;;  %3361 = vmatmul.mubr.msk.f32.vlgmr.msra.gmra.mrb[26].mxu1 %vm173_vm0, %v2358_v28 }
 0x69b   :  { %3893 = vmatpush1.bf16.msra.mxu0 %v4424_v8  ;;  %3924 = vmatpush3.bf16.msra.mxu1 %v4490_v63 }
 0x69c   :  { %3895 = vmatprep.subr.bf16.mxu0 %v4426_v9  ;;  %3925 = vmatprep.subr.bf16.mxu1 %v4294_v37 }
 0x69d   :  { %2567 = vmatprep.mubr.f32.mxu0 %v4293_v0  ;;  %3395 = vmatprep.mubr.msk.f32.mxu1 %vm4295_vm1, %v4293_v0  ;;  %v2676_v0 = vld [vmem:[#allocation11] sm:$0xff] }
 0x69e   :  { %v3946_v8 = vpack.c.bf16 %v2677_v4, %v2676_v0 }
 0x69f   :  { %3897 = vmatpush1.bf16.msra.mxu0 %v4430_v14  ;;  %3927 = vmatpush3.bf16.msra.mxu1 %v4495_v3 }
 0x6a0   :  { %3899 = vmatprep.subr.bf16.mxu0 %v4433_v15  ;;  %3928 = vmatprep.subr.bf16.mxu1 %v4294_v37 }
 0x6a3   :  { %3901 = vmatpush1.bf16.msra.mxu0 %v4436_v20  ;;  %3930 = vmatpush3.bf16.msra.mxu1 %v4501_v7 }
 0x6a4   :  { %3903 = vmatprep.subr.bf16.mxu0 %v4439_v24  ;;  %3931 = vmatprep.subr.bf16.mxu1 %v4294_v37 }
 0x6a7   :  { %3905 = vmatpush1.bf16.msra.mxu0 %v4447_v32  ;;  %3933 = vmatpush3.bf16.msra.mxu1 %v4505_v12  ;;  %v2678_v12 = vld [vmem:[#allocation11 + $0x10] sm:$0xff] }
 0x6a8   :  { %3907 = vmatprep.subr.bf16.mxu0 %v4451_v34  ;;  %3934 = vmatprep.subr.bf16.mxu1 %v4294_v37 }
 0x6ab   :  { %3909 = vmatpush1.bf16.msra.mxu0 %v4456_v40  ;;  %3936 = vmatpush3.bf16.msra.mxu1 %v4509_v17  ;;  %v2679_v17 = vld [vmem:[#allocation11 + $0x18] sm:$0xff] }
 0x6ac   :  { %3911 = vmatprep.subr.bf16.mxu0 %v4461_v41  ;;  %3937 = vmatprep.subr.bf16.mxu1 %v4294_v37  ;;  %v3950_v30 = vpack.c.bf16 %v2679_v17, %v2678_v12 }
 0x6af   :  { %3913 = vmatpush1.bf16.msra.mxu0 %v4466_v49  ;;  %3939 = vmatpush3.bf16.msra.mxu1 %v4513_v21 }
 0x6b0   :  { %3915 = vmatprep.subr.bf16.mxu0 %v4469_v50  ;;  %3940 = vmatprep.subr.bf16.mxu1 %v4294_v37 }
 0x6b3   :  { %3917 = vmatpush1.bf16.msra.mxu0 %v4474_v55  ;;  %3942 = vmatpush3.bf16.msra.mxu1 %v4517_v25  ;;  %v2190_v55 = vadd.f32 %v2189_v47, %v4586_v19 }
 0x6b4   :  { %3919 = vmatprep.subr.bf16.mxu0 %v4478_v56  ;;  %3943 = vmatprep.subr.bf16.mxu1 %v4294_v37 }
 0x6b7   :  { %3921 = vmatpush1.bf16.msra.mxu0 %v4484_v59  ;;  %3945 = vmatpush3.bf16.msra.mxu1 %v4521_v29 }
 0x6b8   :  { %3947 = vmatprep.subr.bf16.mxu0 %v3946_v8 }
 0x769   :  { %v2259_v9 = vpop.f32.mrb[16].mxu0  ;;  %v2330_v14 = vpop.f32.mrb[24].mxu1 }
 0x76a   :  { %v4005_v15 = vadd.f32 %v4643_v58, %v2259_v9  ;;  %v2261_v20 = vpop.f32.mrb[17].mxu0  ;;  %v3355_v24 = vpop.f32.mrb[25].mxu1  ;;  %v2331_v49 = vadd.f32 %v2330_v14, %v4588_v22 }
 0x76b   :  { %v4007_v32 = vadd.f32 %v4647_v60, %v2261_v20 }
 0x76c   :  { %v2871_v31 = vmul.f32 -1.442695, %v4005_v15 }
 0x76d   :  { %v2872_v34 = vmul.f32 -1.442695, %v4007_v32  ;;  %v2499_v11 = vpop.f32.mrb[26].mxu1 }
 0x76e   :  { %4100 = vpow2.f32 %v2871_v31  ;;  %v3362_v13 = vpop.f32.mrb[27].mxu1  ;;  %v2500_v9 = vadd.f32 %v2499_v11, %v4586_v19 }
 0x76f   :  { %4102 = vpow2.f32 %v2872_v34 }
 0x778   :  { %v4101_v40 = vpop.eup %4100 }
 0x779   :  { %v2338_v37 = vadd.f32 1.0, %v4101_v40  ;;  %v4103_v41 = vpop.eup %4102 }
 0x77a   :  { %v2345_v48 = vadd.f32 1.0, %v4103_v41 }
 0x77b   :  { %4104 = vrcp.f32 %v2338_v37 }
 0x77c   :  { %4106 = vrcp.f32 %v2345_v48 }
 0x785   :  { %v4105_v50 = vpop.eup %4104 }
 0x786   :  { %v2348_v56 = vmul.f32 %v4105_v50, %v2331_v49  ;;  %v4107_v63 = vpop.eup %4106 }
 0x787   :  { %v2351_v3 = vsub.f32 1.0, %v4107_v63  ;;  %v2353_v25 = vmul.f32 %v4107_v63, %v4866_v53 }
 0x788   :  { %v2349_v59 = vadd.f32 %v2348_v56, %v2190_v55 }
 0x78a   :  { %4108 = vtanh.f32 %v2349_v59 }
 0x794   :  { %v4109_v7 = vpop.eup %4108 }
 0x795   :  { %v2352_v21 = vmul.f32 %v4109_v7, %v2351_v3 }
 0x797   :  { %v4917_v29 = vadd.f32 %v2353_v25, %v2352_v21 }
 0x799   :  { %2568 = vmatmul.mubr.f32.vlgmr.msra.gmra.mrb[18].mxu0 %v4917_v29  ;;  %3396 = vmatmul.mubr.f32.vlgmr.msra.gmra.mrb[28].mxu1 %v4917_v29 }
 0x79a   :  { %3949 = vmatpush3.bf16.msra.mxu0 %v3946_v8  ;;  %3430 = vmatprep.mubr.f32.mxu0 %v4593_v46  ;;  %v3970_v46 = vpack.c.bf16 %v2689_v2, %v2688_v26 }
 0x79b   :  { %3951 = vmatprep.subr.bf16.mxu0 %v3950_v30 }
 0x79e   :  { %3953 = vmatpush3.bf16.msra.mxu0 %v3950_v30 }
 0x79f   :  { %3955 = vmatprep.subr.bf16.mxu0 %v3954_v39 }
 0x7a2   :  { %3957 = vmatpush3.bf16.msra.mxu0 %v3954_v39 }
 0x7a3   :  { %3959 = vmatprep.subr.bf16.mxu0 %v3958_v52 }
 0x7a6   :  { %3961 = vmatpush3.bf16.msra.mxu0 %v3958_v52 }
 0x7a7   :  { %3963 = vmatprep.subr.bf16.mxu0 %v3962_v45 }
 0x7aa   :  { %3965 = vmatpush3.bf16.msra.mxu0 %v3962_v45 }
 0x7ab   :  { %3967 = vmatprep.subr.bf16.mxu0 %v3966_v1 }
 0x7ae   :  { %3969 = vmatpush3.bf16.msra.mxu0 %v3966_v1 }
 0x7af   :  { %3971 = vmatprep.subr.bf16.mxu0 %v3970_v46 }
 0x7b2   :  { %3973 = vmatpush3.bf16.msra.mxu0 %v3970_v46 }
 0x7b3   :  { %3975 = vmatprep.subr.bf16.mxu0 %v3974_v10 }
 0x7b6   :  { %3977 = vmatpush3.bf16.msra.mxu0 %v3974_v10 }
 0x7b9   :  { %3431 = vmatmul.mubr.f32.vlgmr.msra.gmra.mrb[20].mxu0 %v4654_v43 }
 0x7ba   :  { %3433 = vmatprep.mubr.f32.mxu0 %v4707_v33 }
 0x7bd   :  { %3434 = vmatmul.mubr.f32.gmra.mrb[22].mxu0 %v4760_v27 }
 0x7be   :  { %3436 = vmatprep.mubr.f32.mxu0 %v4813_v57 }
 0x7c1   :  { %3437 = vmatmul.mubr.f32.gmra.mrb[24].mxu0 %v4866_v53 }
 0x7c2   :  { %3439 = vmatprep.mubr.f32.mxu0 %v4917_v29 }
 0x86c   :  { %v2569_v16 = vpop.f32.mrb[18].mxu0  ;;  %v2640_v18 = vpop.f32.mrb[28].mxu1 }
 0x86d   :  { %v4009_v44 = vadd.f32 %v4643_v58, %v2569_v16  ;;  %v2571_v47 = vpop.f32.mrb[19].mxu0  ;;  %v3397_v23 = vpop.f32.mrb[29].mxu1  ;;  %v2641_v4 = vadd.f32 %v2640_v18, %v4588_v22  ;;  %v2877_v58 = vld [vmem:[%s4970_s7] ss:$0 sm:$0xff]  ;;  %s4296_s7 = smov [#allocation13]  }
 0x86e   :  { %v4011_v43 = vadd.f32 %v4647_v60, %v2571_v47  ;;  %s2830_s11 = sshll.u32 %s4296_s7, 4  ;;  %s2831_s11 = int_to_ptr.vmem [resolvable:$true] %s2830_s11 }
 0x86f   :  { %v2875_v28 = vmul.f32 -1.442695, %v4009_v44  ;;  %s4230_s1 = scalar_lea.vmem %s2831_s11, 128  ;;  %p4235_p13 = scmp.lt.s32.totalorder %s2831_s11, %s2831_s11 }
 0x870   :  { %v2876_v33 = vmul.f32 -1.442695, %v4011_v43  ;;  %p4231_p12 = scmp.ne.s32.totalorder %s2831_s11, %s4230_s1  ;;  %p4236_p0 = scmp.lt.s32.totalorder %s4230_s1, %s4230_s1 }
 0x871   :  { %4110 = vpow2.f32 %v2875_v28 }
 0x872   :  { %4112 = vpow2.f32 %v2876_v33  ;;  %p4237_p1 = por %p4236_p0, %p4235_p13 }
 0x874   :  { %p4238_p2 = pnand %p4237_p1, %p4231_p12 }
 0x87b   :  { %v4111_v27 = vpop.eup %4110 }
 0x87c   :  { %v2648_v57 = vadd.f32 1.0, %v4111_v27  ;;  %v4113_v53 = vpop.eup %4112 }
 0x87d   :  { %v2655_v0 = vadd.f32 1.0, %v4113_v53 }
 0x87e   :  { %4114 = vrcp.f32 %v2648_v57 }
 0x87f   :  { %4116 = vrcp.f32 %v2655_v0 }
 0x888   :  { %v4115_v8 = vpop.eup %4114 }
 0x889   :  { %v2658_v14 = vmul.f32 %v4115_v8, %v2641_v4  ;;  %v4117_v37 = vpop.eup %4116 }
 0x88a   :  { %v2661_v50 = vsub.f32 1.0, %v4117_v37  ;;  %v2663_v59 = vmul.f32 %v4117_v37, %v4917_v29 }
 0x88b   :  { %v2659_v60 = vadd.f32 %v2658_v14, %v2500_v9 }
 0x88c   :  { %v3432_v15 = vpop.f32.mrb[20].mxu0 }
 0x88d   :  { %4118 = vtanh.f32 %v2659_v60  ;;  %v2771_v20 = vadd.f32 %v3432_v15, %v2877_v58  ;;  %v2765_v24 = vpop.f32.mrb[21].mxu0 }
 0x88e   :  { %v2766_v31 = vadd.f32 %v2877_v58, %v2765_v24 }
 0x88f   :  { %2805 = vst [vmem:[#allocation12 + $0x8] sm:$0xff] %v2771_v20 }
 0x890   :  { %2804 = vst [vmem:[#allocation12] sm:$0xff] %v2766_v31  ;;  %v3435_v32 = vpop.f32.mrb[22].mxu0 }
 0x891   :  { %v2781_v34 = vadd.f32 %v3435_v32, %v2877_v58  ;;  %v2775_v22 = vpop.f32.mrb[23].mxu0 }
 0x892   :  { %v2776_v40 = vadd.f32 %v2877_v58, %v2775_v22 }
 0x893   :  { %2807 = vst [vmem:[#allocation12 + $0x18] sm:$0xff] %v2781_v34 }
 0x894   :  { %2806 = vst [vmem:[#allocation12 + $0x10] sm:$0xff] %v2776_v40  ;;  %v3438_v19 = vpop.f32.mrb[24].mxu0 }
 0x895   :  { %v2791_v41 = vadd.f32 %v3438_v19, %v2877_v58  ;;  %v2785_v48 = vpop.f32.mrb[25].mxu0 }
 0x896   :  { %v2786_v49 = vadd.f32 %v2877_v58, %v2785_v48 }
 0x897   :  { %v4119_v55 = vpop.eup %4118  ;;  %2809 = vst [vmem:[#allocation12 + $0x28] sm:$0xff] %v2791_v41 }
 0x898   :  { %2808 = vst [vmem:[#allocation12 + $0x20] sm:$0xff] %v2786_v49  ;;  %v2662_v56 = vmul.f32 %v4119_v55, %v2661_v50 }
 0x89a   :  { %v2664_v63 = vadd.f32 %v2663_v59, %v2662_v56 }
 0x89c   :  { %3440 = vmatmul.mubr.f32.gmra.mrb[26].mxu0 %v2664_v63  ;;  %2667 = vst [vmem:[#allocation13] sm:$0xff] %v2664_v63 }
 0x89d   :  { %4241 = shalt.err (!%p4238_p2)
}
 0x89e   :  { %s4242_s15 = scalar_lea.hbm %s4972_s9, 128 }
 0x89f   :  { %p4243_p3 = scmp.ne.s32.totalorder %s4972_s9, %s4242_s15  ;;  %p4246_p4 = scmp.lt.u32.totalorder %s4242_s15, %s4972_s9 }
 0x8a1   :  { %p4248_p5 = pnand %p4246_p4, %p4243_p3 }
 0x8a3   :  { %4251 = shalt.err (!%p4248_p5)
}
 0x8a4   :  { %2833 = dma.vmem_to_hbm [thread:$0]  %s2831_s11, 128, %s4972_s9, [#allocation14]  }
 0x8a5   :  { %s4297_s20 = smov [#allocation12]  }
 0x8a6   :  { %s2817_s21 = sshll.u32 %s4297_s20, 4  ;;  %s2818_s21 = int_to_ptr.vmem [resolvable:$true] %s2817_s21 }
 0x8a7   :  { %s4252_s23 = scalar_lea.vmem %s2818_s21, 1024  ;;  %p4257_p7 = scmp.lt.s32.totalorder %s2818_s21, %s2818_s21 }
 0x8a8   :  { %p4253_p6 = scmp.ne.s32.totalorder %s2818_s21, %s4252_s23  ;;  %p4258_p8 = scmp.lt.s32.totalorder %s4252_s23, %s4252_s23 }
 0x8aa   :  { %p4259_p9 = por %p4258_p8, %p4257_p7 }
 0x8ac   :  { %p4260_p10 = pnand %p4259_p9, %p4253_p6 }
 0x96f   :  { %v3441_v3 = vpop.f32.mrb[26].mxu0 }
 0x970   :  { %v2801_v7 = vadd.f32 %v3441_v3, %v2877_v58  ;;  %v2795_v12 = vpop.f32.mrb[27].mxu0 }
 0x971   :  { %v2796_v17 = vadd.f32 %v2877_v58, %v2795_v12 }
 0x972   :  { %2811 = vst [vmem:[#allocation12 + $0x38] sm:$0xff] %v2801_v7 }
 0x973   :  { %2810 = vst [vmem:[#allocation12 + $0x30] sm:$0xff] %v2796_v17 }
 0x974   :  { %4263 = shalt.err (!%p4260_p10)
}
 0x975   :  { %s4264_s9 = scalar_lea.hbm %s4971_s8, 1024 }
 0x976   :  { %p4265_p11 = scmp.ne.s32.totalorder %s4971_s8, %s4264_s9  ;;  %p4268_p12 = scmp.lt.u32.totalorder %s4264_s9, %s4971_s8 }
 0x978   :  { %p4270_p13 = pnand %p4268_p12, %p4265_p11 }
 0x97a   :  { %4273 = shalt.err (!%p4270_p13)
}
 0x97b   :  { %2823 = dma.vmem_to_hbm [thread:$0]  %s2818_s21, 1024, %s4971_s8, [#allocation5], %s4289_s3, %s4289_s3, %s4290_s22  }
 0x97c   :  { %4280 = dma.done.wait [#allocation5], 1024  }
 0x97d   :  { %4281 = vsyncadd [#allocation5], 4294966272 }
 0x97e   :  { %4282 = dma.done.wait [#allocation14], 128  }
 0x97f   :  { %4283 = vsyncadd [#allocation14], 4294967168 }
 0x980   :  { %2840 = vsyncpa [#allocation4], 1 }
 0x981   :  { %2841 = vsyncpa [#allocation7], 1 }
 0x982   :  { %2842 = vsyncpa [#allocation10], 1 }
 0x983   :  { %2843 = vsyncpa [#allocation5], 1 }
 0x984   :  { %2844 = vsyncpa [#allocation14], 1 }

</bundles_post_ra>
